<compile_context>
chip_gen: v5e
topology: v5e:2x2
jax: 0.10.0
libtpu: 0.0.40
codegen_flags: <defaults>
</compile_context>

<pallas_src>
import functools

import jax
import jax.numpy as jnp
from jax import lax
from jax.experimental import pallas as pl
from jax.experimental.pallas import tpu as pltpu

F32 = jnp.float32
# Whole-array-in-VMEM spec for grid-less calls (all shapes here are tiny).
VMEM = pl.BlockSpec(memory_space=pltpu.MemorySpace.VMEM)


def _const_spec(arr):
    """Whole-array block with a constant index map (fetched once per grid)."""
    nd = arr.ndim
    return pl.BlockSpec(arr.shape, lambda t, _nd=nd: (0,) * _nd)


# ----------------------------------------------------------------------------
# Shared in-kernel helpers
# ----------------------------------------------------------------------------
def _gru_gates(gi, h, whh, bhh, hidden):
    # PyTorch GRUCell semantics (gate order r, z, n); gi already contains
    # x @ W_ih + b_ih.
    H = hidden
    gh = jnp.dot(h, whh, preferred_element_type=F32) + bhh
    r = jax.nn.sigmoid(gi[:, 0:H] + gh[:, 0:H])
    z = jax.nn.sigmoid(gi[:, H:2 * H] + gh[:, H:2 * H])
    n = jnp.tanh(gi[:, 2 * H:3 * H] + r * gh[:, 2 * H:3 * H])
    return (1.0 - z) * n + z * h


# ----------------------------------------------------------------------------
# Fused decoder step kernel (grid over decoder steps, state in VMEM scratch)
# ----------------------------------------------------------------------------
def _decoder_step_kernel(
    # inputs
    tin_ref, enc_ref, mask_ref,
    mem_w, mem_b,
    pre1_w, pre1_b, pre2_w, pre2_b,
    arnn_wx, arnn_wc, arnn_whh, arnn_bih, arnn_bhh,
    q_w, q_b, attn_v,
    pdi_wh, pdi_wc, pdi_b,
    d1_wih, d1_whh, d1_bih, d1_bhh,
    d2_wih, d2_whh, d2_bih, d2_bhh,
    pm_wy, pm_wc, pm_b,
    # outputs
    out_ref, ali_ref,
    # scratch (persists across grid steps)
    keys_scr, attn_h_scr, h1_scr, h2_scr, ctx_scr, prev_scr,
    *, hidden, use_teacher):
    H = hidden
    t = pl.program_id(0)
    B = enc_ref.shape[0]

    @pl.when(t == 0)
    def _init():
        attn_h_scr[...] = jnp.zeros_like(attn_h_scr)
        h1_scr[...] = jnp.zeros_like(h1_scr)
        h2_scr[...] = jnp.zeros_like(h2_scr)
        ctx_scr[...] = jnp.zeros_like(ctx_scr)
        prev_scr[...] = jnp.zeros_like(prev_scr)
        # Bahdanau memory projection, computed once and kept VMEM-resident.
        for b in range(B):  # static unroll over tiny batch
            keys_scr[b] = (jnp.dot(enc_ref[b], mem_w[...],
                                   preferred_element_type=F32) + mem_b[...])

    # Decoder input: previous teacher group (teacher forcing) or previous output.
    frame_in = tin_ref[0] if use_teacher else prev_scr[...]

    # Prenet (dropout omitted for determinism).
    # TODO(synk): Tacotron prenet dropout (active even at inference) omitted.
    x = jnp.maximum(
        jnp.dot(frame_in, pre1_w[...], preferred_element_type=F32) + pre1_b[...], 0.0)
    x = jnp.maximum(
        jnp.dot(x, pre2_w[...], preferred_element_type=F32) + pre2_b[...], 0.0)

    # Attention GRU over [prenet_out, prev_context]; concat avoided via split W_ih.
    c_prev = ctx_scr[...]
    gi = (jnp.dot(x, arnn_wx[...], preferred_element_type=F32)
          + jnp.dot(c_prev, arnn_wc[...], preferred_element_type=F32)
          + arnn_bih[...])
    ah = _gru_gates(gi, attn_h_scr[...], arnn_whh[...], arnn_bhh[...], H)
    attn_h_scr[...] = ah

    # Bahdanau attention: e = v^T tanh(Wq q + Wk keys); masked softmax over T_enc.
    q = jnp.dot(ah, q_w[...], preferred_element_type=F32) + q_b[...]   # (B, A)
    e = jnp.tanh(q[:, None, :] + keys_scr[...])                        # (B, T, A)
    score = jnp.sum(e * attn_v[...][:, None, :], axis=-1)              # (B, T)
    m = mask_ref[...]
    score = jnp.where(m > 0.5, score, -1e30)
    score = score - jnp.max(score, axis=-1, keepdims=True)
    w = jnp.exp(score) * m
    denom = jnp.maximum(jnp.sum(w, axis=-1, keepdims=True), 1e-20)     # NaN guard
    w = w * pl.reciprocal(denom, approx=True)
    ali_ref[0] = w
    c_new = jnp.sum(w[:, :, None] * enc_ref[...], axis=1)              # (B, enc_dim)
    ctx_scr[...] = c_new

    # Decoder-input projection over [attn_h, ctx] (split weights).
    dec_in = (jnp.dot(ah, pdi_wh[...], preferred_element_type=F32)
              + jnp.dot(c_new, pdi_wc[...], preferred_element_type=F32)
              + pdi_b[...])

    # Residual decoder GRUs.
    gi1 = jnp.dot(dec_in, d1_wih[...], preferred_element_type=F32) + d1_bih[...]
    h1n = _gru_gates(gi1, h1_scr[...], d1_whh[...], d1_bhh[...], H)
    h1_scr[...] = h1n
    y = dec_in + h1n

    gi2 = jnp.dot(y, d2_wih[...], preferred_element_type=F32) + d2_bih[...]
    h2n = _gru_gates(gi2, h2_scr[...], d2_whh[...], d2_bhh[...], H)
    h2_scr[...] = h2n
    y = y + h2n

    # Mel projection over [y, ctx] (split weights).
    out = (jnp.dot(y, pm_wy[...], preferred_element_type=F32)
           + jnp.dot(c_new, pm_wc[...], preferred_element_type=F32)
           + pm_b[...])
    out_ref[0] = out
    prev_scr[...] = out


# ----------------------------------------------------------------------------
# 1-D conv + eval-mode BatchNorm kernel (grid over batch, 2-D matmuls per tap)
# ----------------------------------------------------------------------------
def _conv1d_kernel(x_ref, w_ref, scale_ref, shift_ref, o_ref, *, relu):
    T, Cout = o_ref.shape
    K = w_ref.shape[0]
    acc = jnp.zeros((T, Cout), F32)
    for k in range(K):  # static unroll, K <= 8; ref-level slice, no reshape
        acc = acc + jnp.dot(x_ref[k:k + T, :], w_ref[k],
                            preferred_element_type=F32)
    y = acc * scale_ref[...] + shift_ref[...]
    if relu:
        y = jnp.maximum(y, 0.0)
    o_ref[...] = y


def pallas_conv1d_bn(x, w, scale, shift, relu):
    # x: (B, T, Cin), w: (K, Cin, Cout).  Matches nn.Conv1d(padding=K//2)
    # followed by the CBHG [:, :, :T] slice (exact for even and odd K).
    # TODO(synk): production-scale Tm (~800+) should tile T with a BlockSpec
    # grid + vmem_limit_bytes so the whole padded input never has to fit VMEM
    # (v7x 64 MiB / v5e 16 MiB scoped default); at these demo sizes whole-array
    # per-batch blocks are optimal.
    B, T, _ = x.shape
    K, Cin, Cout = w.shape
    pad = K // 2
    xp = jnp.pad(x, ((0, 0), (pad, pad), (0, 0)))
    Tp = T + 2 * pad
    return pl.pallas_call(
        functools.partial(_conv1d_kernel, relu=relu),
        out_shape=jax.ShapeDtypeStruct((B, T, Cout), F32),
        grid_spec=pltpu.PrefetchScalarGridSpec(
            num_scalar_prefetch=0,
            grid=(B,),
            in_specs=[pl.BlockSpec((None, Tp, Cin), lambda b: (b, 0, 0)),
                      pl.BlockSpec((K, Cin, Cout), lambda b: (0, 0, 0)),
                      pl.BlockSpec((1, Cout), lambda b: (0, 0)),
                      pl.BlockSpec((1, Cout), lambda b: (0, 0))],
            out_specs=pl.BlockSpec((None, T, Cout), lambda b: (b, 0, 0))),
        compiler_params=pltpu.CompilerParams(
            dimension_semantics=("parallel",)),
    )(xp, w, scale, shift)


# ----------------------------------------------------------------------------
# Fused highway stack (4 layers) + bidirectional-GRU input-gate precompute
# ----------------------------------------------------------------------------
def _highway_gi_kernel(x_ref, w1s_ref, b1s_ref, w2s_ref, b2s_ref,
                       wih_f_ref, bih_f_ref, wih_b_ref, bih_b_ref,
                       gif_ref, gib_ref, *, n_layers):
    x = x_ref[...]
    for i in range(n_layers):  # static unroll, intermediates stay in vregs
        h = jnp.maximum(
            jnp.dot(x, w1s_ref[i], preferred_element_type=F32) + b1s_ref[i], 0.0)
        tg = jax.nn.sigmoid(
            jnp.dot(x, w2s_ref[i], preferred_element_type=F32) + b2s_ref[i])
        x = h * tg + x * (1.0 - tg)
    gif_ref[...] = jnp.dot(x, wih_f_ref[...], preferred_element_type=F32) + bih_f_ref[...]
    gib_ref[...] = jnp.dot(x, wih_b_ref[...], preferred_element_type=F32) + bih_b_ref[...]


def pallas_highway_gi(x, w1s, b1s, w2s, b2s, wih_f, bih_f, wih_b, bih_b):
    n = x.shape[0]
    g = wih_f.shape[1]
    return pl.pallas_call(
        functools.partial(_highway_gi_kernel, n_layers=w1s.shape[0]),
        out_shape=(jax.ShapeDtypeStruct((n, g), F32),
                   jax.ShapeDtypeStruct((n, g), F32)),
        in_specs=[VMEM] * 9,
        out_specs=(VMEM, VMEM),
    )(x, w1s, b1s, w2s, b2s, wih_f, bih_f, wih_b, bih_b)


# ----------------------------------------------------------------------------
# Fused bidirectional GRU + last_linear kernel (time loop inside the kernel)
# ----------------------------------------------------------------------------
def _bigru_linear_kernel(gif_ref, gib_ref, whh_f, bhh_f, whh_b, bhh_b,
                         wlf, wlb, bl, lin_ref, hf_buf, *, hidden):
    H = hidden
    Tm, B, _ = gif_ref.shape
    unroll = Tm <= 32

    def fwd_body(t, hf):
        hf = _gru_gates(gif_ref[t], hf, whh_f[...], bhh_f[...], H)
        hf_buf[t] = hf
        return hf
    lax.fori_loop(0, Tm, fwd_body, jnp.zeros((B, H), F32), unroll=unroll)

    def bwd_body(s, hb):
        hb = _gru_gates(gib_ref[s], hb, whh_b[...], bhh_b[...], H)
        ot = Tm - 1 - s
        lin_ref[ot] = (jnp.dot(hf_buf[ot], wlf[...], preferred_element_type=F32)
                       + jnp.dot(hb, wlb[...], preferred_element_type=F32)
                       + bl[...])
        return hb
    lax.fori_loop(0, Tm, bwd_body, jnp.zeros((B, H), F32), unroll=unroll)


def pallas_bigru_linear(gi_f, gi_b_rev, p_fwd, p_bwd, wlf, wlb, bl):
    Tm, B, _ = gi_f.shape
    H = p_fwd["w_hh"].shape[0]
    L = wlf.shape[1]
    return pl.pallas_call(
        functools.partial(_bigru_linear_kernel, hidden=H),
        out_shape=jax.ShapeDtypeStruct((Tm, B, L), F32),
        in_specs=[VMEM] * 9,
        out_specs=VMEM,
        scratch_shapes=[pltpu.VMEM((Tm, B, H), F32)],
    )(gi_f, gi_b_rev, p_fwd["w_hh"], p_fwd["b_hh"], p_bwd["w_hh"], p_bwd["b_hh"],
      wlf, wlb, bl)


# ----------------------------------------------------------------------------
# Deterministic parameter init (same structure as reference re-implementation)
# ----------------------------------------------------------------------------
class KeyGen:
    def __init__(self, key):
        self.key = key

    def __call__(self):
        self.key, sub = jax.random.split(self.key)
        return sub


def _init(kg, shape, scale=0.1):
    return (scale * jax.random.normal(kg(), shape)).astype(F32)


def linear_params(kg, din, dout):
    return {"w": _init(kg, (din, dout)), "b": jnp.zeros((1, dout), F32)}


def gru_params(kg, din, h):
    return {"w_ih": _init(kg, (din, 3 * h)), "w_hh": _init(kg, (h, 3 * h)),
            "b_ih": jnp.zeros((1, 3 * h), F32), "b_hh": jnp.zeros((1, 3 * h), F32)}


def conv_bn_params(kg, K, cin, cout):
    # Conv bias and eval-mode BatchNorm (mean=0, var=1, gamma=1, beta=0, eps=1e-5)
    # folded into a per-channel scale/shift.
    w = _init(kg, (K, cin, cout))
    bias = jnp.zeros((1, cout), F32)
    gamma = jnp.ones((1, cout), F32)
    beta = jnp.zeros((1, cout), F32)
    eps = 1e-5
    scale = gamma / jnp.sqrt(1.0 + eps)
    shift = beta + bias * scale
    return {"w": w, "scale": scale, "shift": shift}


def init_tacotron_params(key, mel_dim, linear_dim, enc_dim, r,
                         prenet_sizes=(32, 16), attn_dim=32, dec_hidden=32,
                         cbhg_K=8, cbhg_proj=(256,)):
    kg = KeyGen(key)
    P = {}
    # ---- DecoderTaco ----
    P["prenet1"] = linear_params(kg, mel_dim * r, prenet_sizes[0])
    P["prenet2"] = linear_params(kg, prenet_sizes[0], prenet_sizes[1])
    P["attn_rnn"] = gru_params(kg, prenet_sizes[1] + enc_dim, dec_hidden)
    P["query_layer"] = linear_params(kg, dec_hidden, attn_dim)
    P["memory_layer"] = linear_params(kg, enc_dim, attn_dim)
    P["attn_v"] = _init(kg, (1, attn_dim))
    P["proj_dec_in"] = linear_params(kg, dec_hidden + enc_dim, dec_hidden)
    P["dec_rnn1"] = gru_params(kg, dec_hidden, dec_hidden)
    P["dec_rnn2"] = gru_params(kg, dec_hidden, dec_hidden)
    P["proj_mel"] = linear_params(kg, dec_hidden + enc_dim, mel_dim * r)
    # ---- CBHG postnet: CBHG(mel_dim, K=8, hidden_sizes=[256, mel_dim]) ----
    P["bank"] = [conv_bn_params(kg, k, mel_dim, mel_dim) for k in range(1, cbhg_K + 1)]
    P["proj1"] = conv_bn_params(kg, 3, cbhg_K * mel_dim, cbhg_proj[0])
    P["proj2"] = conv_bn_params(kg, 3, cbhg_proj[0], mel_dim)
    P["highway"] = [{"w1": _init(kg, (mel_dim, mel_dim)), "b1": jnp.zeros((1, mel_dim), F32),
                     "w2": _init(kg, (mel_dim, mel_dim)), "b2": jnp.full((1, mel_dim), -1.0, F32)}
                    for _ in range(4)]
    P["gru_fwd"] = gru_params(kg, mel_dim, mel_dim)
    P["gru_bwd"] = gru_params(kg, mel_dim, mel_dim)
    # ---- last linear ----
    P["last_linear"] = linear_params(kg, mel_dim * 2, linear_dim)
    return P


# ----------------------------------------------------------------------------
# Forward pass
# ----------------------------------------------------------------------------
def tacotron_forward(P, enc_outputs, enc_lengths, teacher, tf_rate=1.0,
                     mel_dim=16, r=2):
    B, T_enc, enc_dim = enc_outputs.shape
    _, T_mel, _ = teacher.shape
    steps = T_mel // r
    mel_r = mel_dim * r
    # TODO(synk): stochastic per-step scheduled sampling (Bernoulli(tf_rate)) is not
    # reproduced; tf_rate >= 0.5 -> full teacher forcing, else free-running feedback.
    use_teacher = float(tf_rate) >= 0.5

    mask = (jnp.arange(T_enc)[None, :] < enc_lengths[:, None]).astype(F32)  # (B, T_enc)

    # Teacher frames grouped by n_frames_per_step; decoder input at step t is the
    # previous group (go-frame = zeros at t=0).
    teacher_grouped = teacher.reshape(B, steps, mel_r)
    teacher_inputs = jnp.concatenate(
        [jnp.zeros((1, B, mel_r), F32),
         jnp.transpose(teacher_grouped[:, :steps - 1], (1, 0, 2))], axis=0)  # (steps,B,mel*r)

    H = P["attn_rnn"]["w_hh"].shape[0]
    A = P["query_layer"]["w"].shape[1]
    p2 = P["prenet2"]["w"].shape[1]

    # Split concatenated weight matrices -> two matmuls inside the fused kernel
    # instead of per-step jnp.concatenate glue.
    arnn_wx = P["attn_rnn"]["w_ih"][:p2]
    arnn_wc = P["attn_rnn"]["w_ih"][p2:]
    pdi_wh = P["proj_dec_in"]["w"][:H]
    pdi_wc = P["proj_dec_in"]["w"][H:]
    pm_wy = P["proj_mel"]["w"][:H]
    pm_wc = P["proj_mel"]["w"][H:]

    dec_inputs = [
        teacher_inputs, enc_outputs, mask,
        P["memory_layer"]["w"], P["memory_layer"]["b"],
        P["prenet1"]["w"], P["prenet1"]["b"],
        P["prenet2"]["w"], P["prenet2"]["b"],
        arnn_wx, arnn_wc, P["attn_rnn"]["w_hh"], P["attn_rnn"]["b_ih"], P["attn_rnn"]["b_hh"],
        P["query_layer"]["w"], P["query_layer"]["b"], P["attn_v"],
        pdi_wh, pdi_wc, P["proj_dec_in"]["b"],
        P["dec_rnn1"]["w_ih"], P["dec_rnn1"]["w_hh"], P["dec_rnn1"]["b_ih"], P["dec_rnn1"]["b_hh"],
        P["dec_rnn2"]["w_ih"], P["dec_rnn2"]["w_hh"], P["dec_rnn2"]["b_ih"], P["dec_rnn2"]["b_hh"],
        pm_wy, pm_wc, P["proj_mel"]["b"],
    ]
    in_specs = [pl.BlockSpec((1, B, mel_r), lambda t: (t, 0, 0))]
    in_specs += [_const_spec(a) for a in dec_inputs[1:]]

    outs, alis = pl.pallas_call(
        functools.partial(_decoder_step_kernel, hidden=H, use_teacher=use_teacher),
        out_shape=(jax.ShapeDtypeStruct((steps, B, mel_r), F32),
                   jax.ShapeDtypeStruct((steps, B, T_enc), F32)),
        grid_spec=pltpu.PrefetchScalarGridSpec(
            num_scalar_prefetch=0,
            grid=(steps,),
            in_specs=in_specs,
            out_specs=[pl.BlockSpec((1, B, mel_r), lambda t: (t, 0, 0)),
                       pl.BlockSpec((1, B, T_enc), lambda t: (t, 0, 0))],
            scratch_shapes=[pltpu.VMEM((B, T_enc, A), F32),   # keys projection
                            pltpu.VMEM((B, H), F32),          # attn GRU hidden
                            pltpu.VMEM((B, H), F32),          # dec GRU1 hidden
                            pltpu.VMEM((B, H), F32),          # dec GRU2 hidden
                            pltpu.VMEM((B, enc_dim), F32),    # context
                            pltpu.VMEM((B, mel_r), F32)]),    # previous output
        compiler_params=pltpu.CompilerParams(
            dimension_semantics=("arbitrary",)),
    )(*dec_inputs)

    # mel_outputs.view(B, -1, mel_dim)
    mel_outputs = jnp.transpose(outs, (1, 0, 2)).reshape(B, steps * r, mel_dim)
    alignments = jnp.transpose(alis, (1, 0, 2))                      # (B, steps, T_enc)

    # ---------------- CBHG postnet ----------------
    Tm = mel_outputs.shape[1]
    Kbank = len(P["bank"])

    # Merged conv bank: pad each bank member to K=Kbank taps, stack along Cout
    # (-> lane-dense Kbank*mel_dim output channels), one conv instead of 8.
    w_bank = jnp.zeros((Kbank, mel_dim, Kbank * mel_dim), F32)
    for idx, p in enumerate(P["bank"]):
        k = idx + 1
        off = Kbank // 2 - k // 2          # align each member's receptive field
        w_bank = w_bank.at[off:off + k, :, idx * mel_dim:(idx + 1) * mel_dim].set(p["w"])
    scale_bank = jnp.concatenate([p["scale"] for p in P["bank"]], axis=-1)
    shift_bank = jnp.concatenate([p["shift"] for p in P["bank"]], axis=-1)

    x_bank = pallas_conv1d_bn(mel_outputs, w_bank, scale_bank, shift_bank, relu=True)
    # MaxPool1d(kernel=2, stride=1, padding=1)[:, :, :Tm]
    xpool_in = jnp.concatenate(
        [jnp.full((B, 1, x_bank.shape[-1]), -jnp.inf, F32), x_bank], axis=1)
    x_pool = jnp.maximum(xpool_in[:, :Tm, :], xpool_in[:, 1:Tm + 1, :])

    # Conv projections [256, mel_dim] with kernel 3.
    x = pallas_conv1d_bn(x_pool, P["proj1"]["w"], P["proj1"]["scale"],
                         P["proj1"]["shift"], relu=True)
    x = pallas_conv1d_bn(x, P["proj2"]["w"], P["proj2"]["scale"],
                         P["proj2"]["shift"], relu=False)
    x = x + mel_outputs                                              # residual

    # Fused 4 highway layers + x@W_ih precompute for both GRU directions.
    w1s = jnp.stack([hp["w1"] for hp in P["highway"]])
    b1s = jnp.stack([hp["b1"] for hp in P["highway"]])
    w2s = jnp.stack([hp["w2"] for hp in P["highway"]])
    b2s = jnp.stack([hp["b2"] for hp in P["highway"]])
    xf = x.reshape(B * Tm, mel_dim)
    gi_f, gi_b = pallas_highway_gi(
        xf, w1s, b1s, w2s, b2s,
        P["gru_fwd"]["w_ih"], P["gru_fwd"]["b_ih"],
        P["gru_bwd"]["w_ih"], P["gru_bwd"]["b_ih"])

    gi_f_t = jnp.transpose(gi_f.reshape(B, Tm, -1), (1, 0, 2))       # (Tm, B, 3*mel)
    gi_b_rev = jnp.transpose(gi_b.reshape(B, Tm, -1), (1, 0, 2))[::-1]

    # Bidirectional GRU + last_linear fused (last_linear W split fwd/bwd).
    wlin = P["last_linear"]["w"]
    lin = pallas_bigru_linear(gi_f_t, gi_b_rev, P["gru_fwd"], P["gru_bwd"],
                              wlin[:mel_dim], wlin[mel_dim:], P["last_linear"]["b"])
    linear_outputs = jnp.transpose(lin, (1, 0, 2))                   # (B, Tm, linear_dim)
    return mel_outputs, alignments, linear_outputs


# ----------------------------------------------------------------------------
if __name__ == "__main__":
    key = jax.random.PRNGKey(0)
    B, T_enc, enc_dim = 2, 8, 32
    mel_dim, linear_dim, r = 16, 32, 2
    T_mel = 8  # 4 decoder steps x n_frames_per_step(=2)

    k1, k2, k3 = jax.random.split(key, 3)
    enc_outputs = jax.random.normal(k1, (B, T_enc, enc_dim), F32)
    teacher = jax.random.normal(k2, (B, T_mel, mel_dim), F32)
    enc_lengths = jnp.array([8, 6], jnp.int32)

    params = init_tacotron_params(k3, mel_dim, linear_dim, enc_dim, r)
    mel, ali, lin = tacotron_forward(params, enc_outputs, enc_lengths, teacher,
                                     tf_rate=1.0, mel_dim=mel_dim, r=r)
    (mel, ali, lin) = jax.block_until_ready((mel, ali, lin))

    assert mel.shape == (B, T_mel, mel_dim)
    assert ali.shape == (B, T_mel // r, T_enc)
    assert lin.shape == (B, T_mel, linear_dim)
    assert bool(jnp.all(jnp.isfinite(mel))) and bool(jnp.all(jnp.isfinite(lin)))
    print("KERNEL_OK")
</pallas_src>

<mosaic_0001>
module attributes {stable_mosaic.version = 11 : i64} {
  func.func @_decoder_step_kernel(%arg0: i32, %arg1: memref<1x2x32xf32, #tpu.memory_space<vmem>>, %arg2: memref<2x8x32xf32, #tpu.memory_space<vmem>>, %arg3: memref<2x8xf32, #tpu.memory_space<vmem>>, %arg4: memref<32x32xf32, #tpu.memory_space<vmem>>, %arg5: memref<1x32xf32, #tpu.memory_space<vmem>>, %arg6: memref<32x32xf32, #tpu.memory_space<vmem>>, %arg7: memref<1x32xf32, #tpu.memory_space<vmem>>, %arg8: memref<32x16xf32, #tpu.memory_space<vmem>>, %arg9: memref<1x16xf32, #tpu.memory_space<vmem>>, %arg10: memref<16x96xf32, #tpu.memory_space<vmem>>, %arg11: memref<32x96xf32, #tpu.memory_space<vmem>>, %arg12: memref<32x96xf32, #tpu.memory_space<vmem>>, %arg13: memref<1x96xf32, #tpu.memory_space<vmem>>, %arg14: memref<1x96xf32, #tpu.memory_space<vmem>>, %arg15: memref<32x32xf32, #tpu.memory_space<vmem>>, %arg16: memref<1x32xf32, #tpu.memory_space<vmem>>, %arg17: memref<1x32xf32, #tpu.memory_space<vmem>>, %arg18: memref<32x32xf32, #tpu.memory_space<vmem>>, %arg19: memref<32x32xf32, #tpu.memory_space<vmem>>, %arg20: memref<1x32xf32, #tpu.memory_space<vmem>>, %arg21: memref<32x96xf32, #tpu.memory_space<vmem>>, %arg22: memref<32x96xf32, #tpu.memory_space<vmem>>, %arg23: memref<1x96xf32, #tpu.memory_space<vmem>>, %arg24: memref<1x96xf32, #tpu.memory_space<vmem>>, %arg25: memref<32x96xf32, #tpu.memory_space<vmem>>, %arg26: memref<32x96xf32, #tpu.memory_space<vmem>>, %arg27: memref<1x96xf32, #tpu.memory_space<vmem>>, %arg28: memref<1x96xf32, #tpu.memory_space<vmem>>, %arg29: memref<32x32xf32, #tpu.memory_space<vmem>>, %arg30: memref<32x32xf32, #tpu.memory_space<vmem>>, %arg31: memref<1x32xf32, #tpu.memory_space<vmem>>, %arg32: memref<1x2x32xf32, #tpu.memory_space<vmem>>, %arg33: memref<1x2x8xf32, #tpu.memory_space<vmem>>, %arg34: memref<2x8x32xf32, #tpu.memory_space<vmem>>, %arg35: memref<2x32xf32, #tpu.memory_space<vmem>>, %arg36: memref<2x32xf32, #tpu.memory_space<vmem>>, %arg37: memref<2x32xf32, #tpu.memory_space<vmem>>, %arg38: memref<2x32xf32, #tpu.memory_space<vmem>>, %arg39: memref<2x32xf32, #tpu.memory_space<vmem>>) attributes {dimension_semantics = [#tpu.dimension_semantics<arbitrary>], iteration_bounds = array<i64: 4>, scalar_prefetch = 0 : i64, scratch_operands = 6 : i64, tpu.core_type = #tpu.core_type<tc>, window_params = [{transform_indices = @transform_0, window_bounds = array<i64: 1, 2, 32>}, {pipeline_mode = #tpu.pipeline_mode<synchronous>, transform_indices = @transform_1, window_bounds = array<i64: 2, 8, 32>}, {pipeline_mode = #tpu.pipeline_mode<synchronous>, transform_indices = @transform_2, window_bounds = array<i64: 2, 8>}, {pipeline_mode = #tpu.pipeline_mode<synchronous>, transform_indices = @transform_3, window_bounds = array<i64: 32, 32>}, {pipeline_mode = #tpu.pipeline_mode<synchronous>, transform_indices = @transform_4, window_bounds = array<i64: 1, 32>}, {pipeline_mode = #tpu.pipeline_mode<synchronous>, transform_indices = @transform_5, window_bounds = array<i64: 32, 32>}, {pipeline_mode = #tpu.pipeline_mode<synchronous>, transform_indices = @transform_6, window_bounds = array<i64: 1, 32>}, {pipeline_mode = #tpu.pipeline_mode<synchronous>, transform_indices = @transform_7, window_bounds = array<i64: 32, 16>}, {pipeline_mode = #tpu.pipeline_mode<synchronous>, transform_indices = @transform_8, window_bounds = array<i64: 1, 16>}, {pipeline_mode = #tpu.pipeline_mode<synchronous>, transform_indices = @transform_9, window_bounds = array<i64: 16, 96>}, {pipeline_mode = #tpu.pipeline_mode<synchronous>, transform_indices = @transform_10, window_bounds = array<i64: 32, 96>}, {pipeline_mode = #tpu.pipeline_mode<synchronous>, transform_indices = @transform_11, window_bounds = array<i64: 32, 96>}, {pipeline_mode = #tpu.pipeline_mode<synchronous>, transform_indices = @transform_12, window_bounds = array<i64: 1, 96>}, {pipeline_mode = #tpu.pipeline_mode<synchronous>, transform_indices = @transform_13, window_bounds = array<i64: 1, 96>}, {pipeline_mode = #tpu.pipeline_mode<synchronous>, transform_indices = @transform_14, window_bounds = array<i64: 32, 32>}, {pipeline_mode = #tpu.pipeline_mode<synchronous>, transform_indices = @transform_15, window_bounds = array<i64: 1, 32>}, {pipeline_mode = #tpu.pipeline_mode<synchronous>, transform_indices = @transform_16, window_bounds = array<i64: 1, 32>}, {pipeline_mode = #tpu.pipeline_mode<synchronous>, transform_indices = @transform_17, window_bounds = array<i64: 32, 32>}, {pipeline_mode = #tpu.pipeline_mode<synchronous>, transform_indices = @transform_18, window_bounds = array<i64: 32, 32>}, {pipeline_mode = #tpu.pipeline_mode<synchronous>, transform_indices = @transform_19, window_bounds = array<i64: 1, 32>}, {pipeline_mode = #tpu.pipeline_mode<synchronous>, transform_indices = @transform_20, window_bounds = array<i64: 32, 96>}, {pipeline_mode = #tpu.pipeline_mode<synchronous>, transform_indices = @transform_21, window_bounds = array<i64: 32, 96>}, {pipeline_mode = #tpu.pipeline_mode<synchronous>, transform_indices = @transform_22, window_bounds = array<i64: 1, 96>}, {pipeline_mode = #tpu.pipeline_mode<synchronous>, transform_indices = @transform_23, window_bounds = array<i64: 1, 96>}, {pipeline_mode = #tpu.pipeline_mode<synchronous>, transform_indices = @transform_24, window_bounds = array<i64: 32, 96>}, {pipeline_mode = #tpu.pipeline_mode<synchronous>, transform_indices = @transform_25, window_bounds = array<i64: 32, 96>}, {pipeline_mode = #tpu.pipeline_mode<synchronous>, transform_indices = @transform_26, window_bounds = array<i64: 1, 96>}, {pipeline_mode = #tpu.pipeline_mode<synchronous>, transform_indices = @transform_27, window_bounds = array<i64: 1, 96>}, {pipeline_mode = #tpu.pipeline_mode<synchronous>, transform_indices = @transform_28, window_bounds = array<i64: 32, 32>}, {pipeline_mode = #tpu.pipeline_mode<synchronous>, transform_indices = @transform_29, window_bounds = array<i64: 32, 32>}, {pipeline_mode = #tpu.pipeline_mode<synchronous>, transform_indices = @transform_30, window_bounds = array<i64: 1, 32>}, {transform_indices = @transform_31, window_bounds = array<i64: 1, 2, 32>}, {transform_indices = @transform_32, window_bounds = array<i64: 1, 2, 8>}]} {
    %c0_i32 = arith.constant 0 : i32
    %0 = arith.cmpi eq, %arg0, %c0_i32 : i32
    %1 = arith.extui %0 : i1 to i32
    %c0_i32_0 = arith.constant 0 : i32
    %2 = arith.cmpi ne, %1, %c0_i32_0 : i32
    scf.if %2 {
      %cst_118 = arith.constant 0.000000e+00 : f32
      %201 = vector.broadcast %cst_118 : f32 to vector<2x32xf32>
      %c0_119 = arith.constant 0 : index
      %c0_120 = arith.constant 0 : index
      %202 = vector.load %arg35[%c0_119, %c0_120] : memref<2x32xf32, #tpu.memory_space<vmem>>, vector<2x32xf32>
      tpu.vector_store %arg35[%c0_119, %c0_120], %201 {strides = array<i32>} : memref<2x32xf32, #tpu.memory_space<vmem>>, vector<2x32xf32>,
      %cst_121 = arith.constant 0.000000e+00 : f32
      %203 = vector.broadcast %cst_121 : f32 to vector<2x32xf32>
      %c0_122 = arith.constant 0 : index
      %c0_123 = arith.constant 0 : index
      %204 = vector.load %arg36[%c0_122, %c0_123] : memref<2x32xf32, #tpu.memory_space<vmem>>, vector<2x32xf32>
      tpu.vector_store %arg36[%c0_122, %c0_123], %203 {strides = array<i32>} : memref<2x32xf32, #tpu.memory_space<vmem>>, vector<2x32xf32>,
      %cst_124 = arith.constant 0.000000e+00 : f32
      %205 = vector.broadcast %cst_124 : f32 to vector<2x32xf32>
      %c0_125 = arith.constant 0 : index
      %c0_126 = arith.constant 0 : index
      %206 = vector.load %arg37[%c0_125, %c0_126] : memref<2x32xf32, #tpu.memory_space<vmem>>, vector<2x32xf32>
      tpu.vector_store %arg37[%c0_125, %c0_126], %205 {strides = array<i32>} : memref<2x32xf32, #tpu.memory_space<vmem>>, vector<2x32xf32>,
      %cst_127 = arith.constant 0.000000e+00 : f32
      %207 = vector.broadcast %cst_127 : f32 to vector<2x32xf32>
      %c0_128 = arith.constant 0 : index
      %c0_129 = arith.constant 0 : index
      %208 = vector.load %arg38[%c0_128, %c0_129] : memref<2x32xf32, #tpu.memory_space<vmem>>, vector<2x32xf32>
      tpu.vector_store %arg38[%c0_128, %c0_129], %207 {strides = array<i32>} : memref<2x32xf32, #tpu.memory_space<vmem>>, vector<2x32xf32>,
      %cst_130 = arith.constant 0.000000e+00 : f32
      %209 = vector.broadcast %cst_130 : f32 to vector<2x32xf32>
      %c0_131 = arith.constant 0 : index
      %c0_132 = arith.constant 0 : index
      %210 = vector.load %arg39[%c0_131, %c0_132] : memref<2x32xf32, #tpu.memory_space<vmem>>, vector<2x32xf32>
      tpu.vector_store %arg39[%c0_131, %c0_132], %209 {strides = array<i32>} : memref<2x32xf32, #tpu.memory_space<vmem>>, vector<2x32xf32>,
      %c0_133 = arith.constant 0 : index
      %c0_134 = arith.constant 0 : index
      %c0_135 = arith.constant 0 : index
      %211 = vector.load %arg2[%c0_133, %c0_134, %c0_135] : memref<2x8x32xf32, #tpu.memory_space<vmem>>, vector<1x8x32xf32>
      %212 = vector.shape_cast %211 : vector<1x8x32xf32> to vector<8x32xf32>
      %c0_136 = arith.constant 0 : index
      %c0_137 = arith.constant 0 : index
      %213 = vector.load %arg4[%c0_136, %c0_137] : memref<32x32xf32, #tpu.memory_space<vmem>>, vector<32x32xf32>
      %cst_138 = arith.constant dense<0.000000e+00> : vector<8x32xf32>
      %214 = tpu.matmul %212, %213, %cst_138 {dimension_numbers = #tpu.dot_dimension_numbers<[1], [0], [0], [1], [0, 0, 1, 1], [], []>} : vector<8x32xf32>, vector<32x32xf32>, vector<8x32xf32> -> vector<8x32xf32>
      %c0_139 = arith.constant 0 : index
      %c0_140 = arith.constant 0 : index
      %215 = vector.load %arg5[%c0_139, %c0_140] : memref<1x32xf32, #tpu.memory_space<vmem>>, vector<1x32xf32>
      %216 = vector.broadcast %215 : vector<1x32xf32> to vector<8x32xf32>
      %217 = arith.addf %214, %216 : vector<8x32xf32>
      %c0_141 = arith.constant 0 : index
      %c0_142 = arith.constant 0 : index
      %c0_143 = arith.constant 0 : index
      %218 = vector.load %arg34[%c0_141, %c0_142, %c0_143] : memref<2x8x32xf32, #tpu.memory_space<vmem>>, vector<1x8x32xf32>
      %219 = vector.shape_cast %218 : vector<1x8x32xf32> to vector<8x32xf32>
      %220 = vector.shape_cast %217 : vector<8x32xf32> to vector<1x8x32xf32>
      tpu.vector_store %arg34[%c0_141, %c0_142, %c0_143], %220 {strides = array<i32>} : memref<2x8x32xf32, #tpu.memory_space<vmem>>, vector<1x8x32xf32>,
      %c1 = arith.constant 1 : index
      %c0_144 = arith.constant 0 : index
      %c0_145 = arith.constant 0 : index
      %221 = vector.load %arg2[%c1, %c0_144, %c0_145] : memref<2x8x32xf32, #tpu.memory_space<vmem>>, vector<1x8x32xf32>
      %222 = vector.shape_cast %221 : vector<1x8x32xf32> to vector<8x32xf32>
      %c0_146 = arith.constant 0 : index
      %c0_147 = arith.constant 0 : index
      %223 = vector.load %arg4[%c0_146, %c0_147] : memref<32x32xf32, #tpu.memory_space<vmem>>, vector<32x32xf32>
      %cst_148 = arith.constant dense<0.000000e+00> : vector<8x32xf32>
      %224 = tpu.matmul %222, %223, %cst_148 {dimension_numbers = #tpu.dot_dimension_numbers<[1], [0], [0], [1], [0, 0, 1, 1], [], []>} : vector<8x32xf32>, vector<32x32xf32>, vector<8x32xf32> -> vector<8x32xf32>
      %c0_149 = arith.constant 0 : index
      %c0_150 = arith.constant 0 : index
      %225 = vector.load %arg5[%c0_149, %c0_150] : memref<1x32xf32, #tpu.memory_space<vmem>>, vector<1x32xf32>
      %226 = vector.broadcast %225 : vector<1x32xf32> to vector<8x32xf32>
      %227 = arith.addf %224, %226 : vector<8x32xf32>
      %c1_151 = arith.constant 1 : index
      %c0_152 = arith.constant 0 : index
      %c0_153 = arith.constant 0 : index
      %228 = vector.load %arg34[%c1_151, %c0_152, %c0_153] : memref<2x8x32xf32, #tpu.memory_space<vmem>>, vector<1x8x32xf32>
      %229 = vector.shape_cast %228 : vector<1x8x32xf32> to vector<8x32xf32>
      %230 = vector.shape_cast %227 : vector<8x32xf32> to vector<1x8x32xf32>
      tpu.vector_store %arg34[%c1_151, %c0_152, %c0_153], %230 {strides = array<i32>} : memref<2x8x32xf32, #tpu.memory_space<vmem>>, vector<1x8x32xf32>,
    } else {
    }
    %c0 = arith.constant 0 : index
    %c0_1 = arith.constant 0 : index
    %c0_2 = arith.constant 0 : index
    %3 = vector.load %arg1[%c0, %c0_1, %c0_2] : memref<1x2x32xf32, #tpu.memory_space<vmem>>, vector<1x2x32xf32>
    %4 = vector.shape_cast %3 : vector<1x2x32xf32> to vector<2x32xf32>
    %c0_3 = arith.constant 0 : index
    %c0_4 = arith.constant 0 : index
    %5 = vector.load %arg6[%c0_3, %c0_4] : memref<32x32xf32, #tpu.memory_space<vmem>>, vector<32x32xf32>
    %cst = arith.constant dense<0.000000e+00> : vector<2x32xf32>
    %6 = tpu.matmul %4, %5, %cst {dimension_numbers = #tpu.dot_dimension_numbers<[1], [0], [0], [1], [0, 0, 1, 1], [], []>} : vector<2x32xf32>, vector<32x32xf32>, vector<2x32xf32> -> vector<2x32xf32>
    %c0_5 = arith.constant 0 : index
    %c0_6 = arith.constant 0 : index
    %7 = vector.load %arg7[%c0_5, %c0_6] : memref<1x32xf32, #tpu.memory_space<vmem>>, vector<1x32xf32>
    %8 = vector.broadcast %7 : vector<1x32xf32> to vector<2x32xf32>
    %9 = arith.addf %6, %8 : vector<2x32xf32>
    %cst_7 = arith.constant 0.000000e+00 : f32
    %10 = vector.broadcast %cst_7 : f32 to vector<2x32xf32>
    %11 = arith.maximumf %9, %10 : vector<2x32xf32>
    %c0_8 = arith.constant 0 : index
    %c0_9 = arith.constant 0 : index
    %12 = vector.load %arg8[%c0_8, %c0_9] : memref<32x16xf32, #tpu.memory_space<vmem>>, vector<32x16xf32>
    %cst_10 = arith.constant dense<0.000000e+00> : vector<2x16xf32>
    %13 = tpu.matmul %11, %12, %cst_10 {dimension_numbers = #tpu.dot_dimension_numbers<[1], [0], [0], [1], [0, 0, 1, 1], [], []>} : vector<2x32xf32>, vector<32x16xf32>, vector<2x16xf32> -> vector<2x16xf32>
    %c0_11 = arith.constant 0 : index
    %c0_12 = arith.constant 0 : index
    %14 = vector.load %arg9[%c0_11, %c0_12] : memref<1x16xf32, #tpu.memory_space<vmem>>, vector<1x16xf32>
    %15 = vector.broadcast %14 : vector<1x16xf32> to vector<2x16xf32>
    %16 = arith.addf %13, %15 : vector<2x16xf32>
    %cst_13 = arith.constant 0.000000e+00 : f32
    %17 = vector.broadcast %cst_13 : f32 to vector<2x16xf32>
    %18 = arith.maximumf %16, %17 : vector<2x16xf32>
    %c0_14 = arith.constant 0 : index
    %c0_15 = arith.constant 0 : index
    %19 = vector.load %arg38[%c0_14, %c0_15] : memref<2x32xf32, #tpu.memory_space<vmem>>, vector<2x32xf32>
    %c0_16 = arith.constant 0 : index
    %c0_17 = arith.constant 0 : index
    %20 = vector.load %arg10[%c0_16, %c0_17] : memref<16x96xf32, #tpu.memory_space<vmem>>, vector<16x96xf32>
    %cst_18 = arith.constant dense<0.000000e+00> : vector<2x96xf32>
    %21 = tpu.matmul %18, %20, %cst_18 {dimension_numbers = #tpu.dot_dimension_numbers<[1], [0], [0], [1], [0, 0, 1, 1], [], []>} : vector<2x16xf32>, vector<16x96xf32>, vector<2x96xf32> -> vector<2x96xf32>
    %c0_19 = arith.constant 0 : index
    %c0_20 = arith.constant 0 : index
    %22 = vector.load %arg11[%c0_19, %c0_20] : memref<32x96xf32, #tpu.memory_space<vmem>>, vector<32x96xf32>
    %cst_21 = arith.constant dense<0.000000e+00> : vector<2x96xf32>
    %23 = tpu.matmul %19, %22, %cst_21 {dimension_numbers = #tpu.dot_dimension_numbers<[1], [0], [0], [1], [0, 0, 1, 1], [], []>} : vector<2x32xf32>, vector<32x96xf32>, vector<2x96xf32> -> vector<2x96xf32>
    %24 = arith.addf %21, %23 : vector<2x96xf32>
    %c0_22 = arith.constant 0 : index
    %c0_23 = arith.constant 0 : index
    %25 = vector.load %arg13[%c0_22, %c0_23] : memref<1x96xf32, #tpu.memory_space<vmem>>, vector<1x96xf32>
    %26 = vector.broadcast %25 : vector<1x96xf32> to vector<2x96xf32>
    %27 = arith.addf %24, %26 : vector<2x96xf32>
    %c0_24 = arith.constant 0 : index
    %c0_25 = arith.constant 0 : index
    %28 = vector.load %arg35[%c0_24, %c0_25] : memref<2x32xf32, #tpu.memory_space<vmem>>, vector<2x32xf32>
    %c0_26 = arith.constant 0 : index
    %c0_27 = arith.constant 0 : index
    %29 = vector.load %arg12[%c0_26, %c0_27] : memref<32x96xf32, #tpu.memory_space<vmem>>, vector<32x96xf32>
    %c0_28 = arith.constant 0 : index
    %c0_29 = arith.constant 0 : index
    %30 = vector.load %arg14[%c0_28, %c0_29] : memref<1x96xf32, #tpu.memory_space<vmem>>, vector<1x96xf32>
    %cst_30 = arith.constant dense<0.000000e+00> : vector<2x96xf32>
    %31 = tpu.matmul %28, %29, %cst_30 {dimension_numbers = #tpu.dot_dimension_numbers<[1], [0], [0], [1], [0, 0, 1, 1], [], []>} : vector<2x32xf32>, vector<32x96xf32>, vector<2x96xf32> -> vector<2x96xf32>
    %32 = vector.broadcast %30 : vector<1x96xf32> to vector<2x96xf32>
    %33 = arith.addf %31, %32 : vector<2x96xf32>
    %34 = vector.extract_strided_slice %27 {offsets = [0, 0], sizes = [2, 32], strides = [1, 1]} : vector<2x96xf32> to vector<2x32xf32>
    %35 = vector.extract_strided_slice %33 {offsets = [0, 0], sizes = [2, 32], strides = [1, 1]} : vector<2x96xf32> to vector<2x32xf32>
    %36 = arith.addf %34, %35 : vector<2x32xf32>
    %37 = arith.negf %36 : vector<2x32xf32>
    %38 = math.exp %37 : vector<2x32xf32>
    %cst_31 = arith.constant 1.000000e+00 : f32
    %39 = vector.broadcast %cst_31 : f32 to vector<2x32xf32>
    %40 = arith.addf %39, %38 : vector<2x32xf32>
    %41 = arith.divf %39, %40 : vector<2x32xf32>
    %42 = vector.extract_strided_slice %27 {offsets = [0, 32], sizes = [2, 32], strides = [1, 1]} : vector<2x96xf32> to vector<2x32xf32>
    %43 = vector.extract_strided_slice %33 {offsets = [0, 32], sizes = [2, 32], strides = [1, 1]} : vector<2x96xf32> to vector<2x32xf32>
    %44 = arith.addf %42, %43 : vector<2x32xf32>
    %45 = arith.negf %44 : vector<2x32xf32>
    %46 = math.exp %45 : vector<2x32xf32>
    %cst_32 = arith.constant 1.000000e+00 : f32
    %47 = vector.broadcast %cst_32 : f32 to vector<2x32xf32>
    %48 = arith.addf %47, %46 : vector<2x32xf32>
    %49 = arith.divf %47, %48 : vector<2x32xf32>
    %50 = vector.extract_strided_slice %27 {offsets = [0, 64], sizes = [2, 32], strides = [1, 1]} : vector<2x96xf32> to vector<2x32xf32>
    %51 = vector.extract_strided_slice %33 {offsets = [0, 64], sizes = [2, 32], strides = [1, 1]} : vector<2x96xf32> to vector<2x32xf32>
    %52 = arith.mulf %41, %51 : vector<2x32xf32>
    %53 = arith.addf %50, %52 : vector<2x32xf32>
    %54 = math.tanh %53 : vector<2x32xf32>
    %cst_33 = arith.constant 1.000000e+00 : f32
    %55 = vector.broadcast %cst_33 : f32 to vector<2x32xf32>
    %56 = arith.subf %55, %49 : vector<2x32xf32>
    %57 = arith.mulf %56, %54 : vector<2x32xf32>
    %58 = arith.mulf %49, %28 : vector<2x32xf32>
    %59 = arith.addf %57, %58 : vector<2x32xf32>
    %c0_34 = arith.constant 0 : index
    %c0_35 = arith.constant 0 : index
    %60 = vector.load %arg35[%c0_34, %c0_35] : memref<2x32xf32, #tpu.memory_space<vmem>>, vector<2x32xf32>
    tpu.vector_store %arg35[%c0_34, %c0_35], %59 {strides = array<i32>} : memref<2x32xf32, #tpu.memory_space<vmem>>, vector<2x32xf32>,
    %c0_36 = arith.constant 0 : index
    %c0_37 = arith.constant 0 : index
    %61 = vector.load %arg15[%c0_36, %c0_37] : memref<32x32xf32, #tpu.memory_space<vmem>>, vector<32x32xf32>
    %cst_38 = arith.constant dense<0.000000e+00> : vector<2x32xf32>
    %62 = tpu.matmul %59, %61, %cst_38 {dimension_numbers = #tpu.dot_dimension_numbers<[1], [0], [0], [1], [0, 0, 1, 1], [], []>} : vector<2x32xf32>, vector<32x32xf32>, vector<2x32xf32> -> vector<2x32xf32>
    %c0_39 = arith.constant 0 : index
    %c0_40 = arith.constant 0 : index
    %63 = vector.load %arg16[%c0_39, %c0_40] : memref<1x32xf32, #tpu.memory_space<vmem>>, vector<1x32xf32>
    %64 = vector.broadcast %63 : vector<1x32xf32> to vector<2x32xf32>
    %65 = arith.addf %62, %64 : vector<2x32xf32>
    %66 = vector.shape_cast %65 : vector<2x32xf32> to vector<2x1x32xf32>
    %c0_41 = arith.constant 0 : index
    %c0_42 = arith.constant 0 : index
    %c0_43 = arith.constant 0 : index
    %67 = vector.load %arg34[%c0_41, %c0_42, %c0_43] : memref<2x8x32xf32, #tpu.memory_space<vmem>>, vector<2x8x32xf32>
    %68 = vector.broadcast %66 : vector<2x1x32xf32> to vector<2x8x32xf32>
    %69 = arith.addf %68, %67 : vector<2x8x32xf32>
    %70 = math.tanh %69 : vector<2x8x32xf32>
    %c0_44 = arith.constant 0 : index
    %c0_45 = arith.constant 0 : index
    %71 = vector.load %arg17[%c0_44, %c0_45] : memref<1x32xf32, #tpu.memory_space<vmem>>, vector<1x32xf32>
    %72 = vector.shape_cast %71 : vector<1x32xf32> to vector<1x1x32xf32>
    %73 = vector.broadcast %72 : vector<1x1x32xf32> to vector<2x8x32xf32>
    %74 = arith.mulf %70, %73 : vector<2x8x32xf32>
    %cst_46 = arith.constant dense<0.000000e+00> : vector<2x8xf32>
    %75 = vector.multi_reduction <add>, %74, %cst_46 [2] : vector<2x8x32xf32> to vector<2x8xf32>
    %c0_47 = arith.constant 0 : index
    %c0_48 = arith.constant 0 : index
    %76 = vector.load %arg3[%c0_47, %c0_48] : memref<2x8xf32, #tpu.memory_space<vmem>>, vector<2x8xf32>
    %cst_49 = arith.constant 5.000000e-01 : f32
    %77 = vector.broadcast %cst_49 : f32 to vector<2x8xf32>
    %78 = arith.cmpf ogt, %76, %77 : vector<2x8xf32>
    %cst_50 = arith.constant -1.000000e+30 : f32
    %79 = vector.broadcast %cst_50 : f32 to vector<2x8xf32>
    %80 = arith.select %78, %75, %79 : vector<2x8xi1>, vector<2x8xf32>
    %cst_51 = arith.constant dense<0xFF800000> : vector<2xf32>
    %81 = vector.multi_reduction <maximumf>, %80, %cst_51 [1] : vector<2x8xf32> to vector<2xf32>
    %82 = vector.shape_cast %81 : vector<2xf32> to vector<2x1xf32>
    %83 = vector.broadcast %82 : vector<2x1xf32> to vector<2x8xf32>
    %84 = arith.subf %80, %83 : vector<2x8xf32>
    %85 = math.exp %84 : vector<2x8xf32>
    %86 = arith.mulf %85, %76 : vector<2x8xf32>
    %cst_52 = arith.constant dense<0.000000e+00> : vector<2xf32>
    %87 = vector.multi_reduction <add>, %86, %cst_52 [1] : vector<2x8xf32> to vector<2xf32>
    %88 = vector.shape_cast %87 : vector<2xf32> to vector<2x1xf32>
    %cst_53 = arith.constant 9.99999968E-21 : f32
    %89 = vector.broadcast %cst_53 : f32 to vector<2x1xf32>
    %90 = arith.maximumf %88, %89 : vector<2x1xf32>
    %91 = tpu.reciprocal %90 {approx = true} : vector<2x1xf32> -> vector<2x1xf32>
    %92 = vector.broadcast %91 : vector<2x1xf32> to vector<2x8xf32>
    %93 = arith.mulf %86, %92 : vector<2x8xf32>
    %c0_54 = arith.constant 0 : index
    %c0_55 = arith.constant 0 : index
    %c0_56 = arith.constant 0 : index
    %94 = vector.load %arg33[%c0_54, %c0_55, %c0_56] : memref<1x2x8xf32, #tpu.memory_space<vmem>>, vector<1x2x8xf32>
    %95 = vector.shape_cast %94 : vector<1x2x8xf32> to vector<2x8xf32>
    %96 = vector.shape_cast %93 : vector<2x8xf32> to vector<1x2x8xf32>
    tpu.vector_store %arg33[%c0_54, %c0_55, %c0_56], %96 {strides = array<i32>} : memref<1x2x8xf32, #tpu.memory_space<vmem>>, vector<1x2x8xf32>,
    %97 = vector.shape_cast %93 : vector<2x8xf32> to vector<2x8x1xf32>
    %c0_57 = arith.constant 0 : index
    %c0_58 = arith.constant 0 : index
    %c0_59 = arith.constant 0 : index
    %98 = vector.load %arg2[%c0_57, %c0_58, %c0_59] : memref<2x8x32xf32, #tpu.memory_space<vmem>>, vector<2x8x32xf32>
    %99 = vector.broadcast %97 : vector<2x8x1xf32> to vector<2x8x32xf32>
    %100 = arith.mulf %99, %98 : vector<2x8x32xf32>
    %cst_60 = arith.constant dense<0.000000e+00> : vector<2x32xf32>
    %101 = vector.multi_reduction <add>, %100, %cst_60 [1] : vector<2x8x32xf32> to vector<2x32xf32>
    %c0_61 = arith.constant 0 : index
    %c0_62 = arith.constant 0 : index
    %102 = vector.load %arg38[%c0_61, %c0_62] : memref<2x32xf32, #tpu.memory_space<vmem>>, vector<2x32xf32>
    tpu.vector_store %arg38[%c0_61, %c0_62], %101 {strides = array<i32>} : memref<2x32xf32, #tpu.memory_space<vmem>>, vector<2x32xf32>,
    %c0_63 = arith.constant 0 : index
    %c0_64 = arith.constant 0 : index
    %103 = vector.load %arg18[%c0_63, %c0_64] : memref<32x32xf32, #tpu.memory_space<vmem>>, vector<32x32xf32>
    %cst_65 = arith.constant dense<0.000000e+00> : vector<2x32xf32>
    %104 = tpu.matmul %59, %103, %cst_65 {dimension_numbers = #tpu.dot_dimension_numbers<[1], [0], [0], [1], [0, 0, 1, 1], [], []>} : vector<2x32xf32>, vector<32x32xf32>, vector<2x32xf32> -> vector<2x32xf32>
    %c0_66 = arith.constant 0 : index
    %c0_67 = arith.constant 0 : index
    %105 = vector.load %arg19[%c0_66, %c0_67] : memref<32x32xf32, #tpu.memory_space<vmem>>, vector<32x32xf32>
    %cst_68 = arith.constant dense<0.000000e+00> : vector<2x32xf32>
    %106 = tpu.matmul %101, %105, %cst_68 {dimension_numbers = #tpu.dot_dimension_numbers<[1], [0], [0], [1], [0, 0, 1, 1], [], []>} : vector<2x32xf32>, vector<32x32xf32>, vector<2x32xf32> -> vector<2x32xf32>
    %107 = arith.addf %104, %106 : vector<2x32xf32>
    %c0_69 = arith.constant 0 : index
    %c0_70 = arith.constant 0 : index
    %108 = vector.load %arg20[%c0_69, %c0_70] : memref<1x32xf32, #tpu.memory_space<vmem>>, vector<1x32xf32>
    %109 = vector.broadcast %108 : vector<1x32xf32> to vector<2x32xf32>
    %110 = arith.addf %107, %109 : vector<2x32xf32>
    %c0_71 = arith.constant 0 : index
    %c0_72 = arith.constant 0 : index
    %111 = vector.load %arg21[%c0_71, %c0_72] : memref<32x96xf32, #tpu.memory_space<vmem>>, vector<32x96xf32>
    %cst_73 = arith.constant dense<0.000000e+00> : vector<2x96xf32>
    %112 = tpu.matmul %110, %111, %cst_73 {dimension_numbers = #tpu.dot_dimension_numbers<[1], [0], [0], [1], [0, 0, 1, 1], [], []>} : vector<2x32xf32>, vector<32x96xf32>, vector<2x96xf32> -> vector<2x96xf32>
    %c0_74 = arith.constant 0 : index
    %c0_75 = arith.constant 0 : index
    %113 = vector.load %arg23[%c0_74, %c0_75] : memref<1x96xf32, #tpu.memory_space<vmem>>, vector<1x96xf32>
    %114 = vector.broadcast %113 : vector<1x96xf32> to vector<2x96xf32>
    %115 = arith.addf %112, %114 : vector<2x96xf32>
    %c0_76 = arith.constant 0 : index
    %c0_77 = arith.constant 0 : index
    %116 = vector.load %arg36[%c0_76, %c0_77] : memref<2x32xf32, #tpu.memory_space<vmem>>, vector<2x32xf32>
    %c0_78 = arith.constant 0 : index
    %c0_79 = arith.constant 0 : index
    %117 = vector.load %arg22[%c0_78, %c0_79] : memref<32x96xf32, #tpu.memory_space<vmem>>, vector<32x96xf32>
    %c0_80 = arith.constant 0 : index
    %c0_81 = arith.constant 0 : index
    %118 = vector.load %arg24[%c0_80, %c0_81] : memref<1x96xf32, #tpu.memory_space<vmem>>, vector<1x96xf32>
    %cst_82 = arith.constant dense<0.000000e+00> : vector<2x96xf32>
    %119 = tpu.matmul %116, %117, %cst_82 {dimension_numbers = #tpu.dot_dimension_numbers<[1], [0], [0], [1], [0, 0, 1, 1], [], []>} : vector<2x32xf32>, vector<32x96xf32>, vector<2x96xf32> -> vector<2x96xf32>
    %120 = vector.broadcast %118 : vector<1x96xf32> to vector<2x96xf32>
    %121 = arith.addf %119, %120 : vector<2x96xf32>
    %122 = vector.extract_strided_slice %115 {offsets = [0, 0], sizes = [2, 32], strides = [1, 1]} : vector<2x96xf32> to vector<2x32xf32>
    %123 = vector.extract_strided_slice %121 {offsets = [0, 0], sizes = [2, 32], strides = [1, 1]} : vector<2x96xf32> to vector<2x32xf32>
    %124 = arith.addf %122, %123 : vector<2x32xf32>
    %125 = arith.negf %124 : vector<2x32xf32>
    %126 = math.exp %125 : vector<2x32xf32>
    %cst_83 = arith.constant 1.000000e+00 : f32
    %127 = vector.broadcast %cst_83 : f32 to vector<2x32xf32>
    %128 = arith.addf %127, %126 : vector<2x32xf32>
    %129 = arith.divf %127, %128 : vector<2x32xf32>
    %130 = vector.extract_strided_slice %115 {offsets = [0, 32], sizes = [2, 32], strides = [1, 1]} : vector<2x96xf32> to vector<2x32xf32>
    %131 = vector.extract_strided_slice %121 {offsets = [0, 32], sizes = [2, 32], strides = [1, 1]} : vector<2x96xf32> to vector<2x32xf32>
    %132 = arith.addf %130, %131 : vector<2x32xf32>
    %133 = arith.negf %132 : vector<2x32xf32>
    %134 = math.exp %133 : vector<2x32xf32>
    %cst_84 = arith.constant 1.000000e+00 : f32
    %135 = vector.broadcast %cst_84 : f32 to vector<2x32xf32>
    %136 = arith.addf %135, %134 : vector<2x32xf32>
    %137 = arith.divf %135, %136 : vector<2x32xf32>
    %138 = vector.extract_strided_slice %115 {offsets = [0, 64], sizes = [2, 32], strides = [1, 1]} : vector<2x96xf32> to vector<2x32xf32>
    %139 = vector.extract_strided_slice %121 {offsets = [0, 64], sizes = [2, 32], strides = [1, 1]} : vector<2x96xf32> to vector<2x32xf32>
    %140 = arith.mulf %129, %139 : vector<2x32xf32>
    %141 = arith.addf %138, %140 : vector<2x32xf32>
    %142 = math.tanh %141 : vector<2x32xf32>
    %cst_85 = arith.constant 1.000000e+00 : f32
    %143 = vector.broadcast %cst_85 : f32 to vector<2x32xf32>
    %144 = arith.subf %143, %137 : vector<2x32xf32>
    %145 = arith.mulf %144, %142 : vector<2x32xf32>
    %146 = arith.mulf %137, %116 : vector<2x32xf32>
    %147 = arith.addf %145, %146 : vector<2x32xf32>
    %c0_86 = arith.constant 0 : index
    %c0_87 = arith.constant 0 : index
    %148 = vector.load %arg36[%c0_86, %c0_87] : memref<2x32xf32, #tpu.memory_space<vmem>>, vector<2x32xf32>
    tpu.vector_store %arg36[%c0_86, %c0_87], %147 {strides = array<i32>} : memref<2x32xf32, #tpu.memory_space<vmem>>, vector<2x32xf32>,
    %149 = arith.addf %110, %147 : vector<2x32xf32>
    %c0_88 = arith.constant 0 : index
    %c0_89 = arith.constant 0 : index
    %150 = vector.load %arg25[%c0_88, %c0_89] : memref<32x96xf32, #tpu.memory_space<vmem>>, vector<32x96xf32>
    %cst_90 = arith.constant dense<0.000000e+00> : vector<2x96xf32>
    %151 = tpu.matmul %149, %150, %cst_90 {dimension_numbers = #tpu.dot_dimension_numbers<[1], [0], [0], [1], [0, 0, 1, 1], [], []>} : vector<2x32xf32>, vector<32x96xf32>, vector<2x96xf32> -> vector<2x96xf32>
    %c0_91 = arith.constant 0 : index
    %c0_92 = arith.constant 0 : index
    %152 = vector.load %arg27[%c0_91, %c0_92] : memref<1x96xf32, #tpu.memory_space<vmem>>, vector<1x96xf32>
    %153 = vector.broadcast %152 : vector<1x96xf32> to vector<2x96xf32>
    %154 = arith.addf %151, %153 : vector<2x96xf32>
    %c0_93 = arith.constant 0 : index
    %c0_94 = arith.constant 0 : index
    %155 = vector.load %arg37[%c0_93, %c0_94] : memref<2x32xf32, #tpu.memory_space<vmem>>, vector<2x32xf32>
    %c0_95 = arith.constant 0 : index
    %c0_96 = arith.constant 0 : index
    %156 = vector.load %arg26[%c0_95, %c0_96] : memref<32x96xf32, #tpu.memory_space<vmem>>, vector<32x96xf32>
    %c0_97 = arith.constant 0 : index
    %c0_98 = arith.constant 0 : index
    %157 = vector.load %arg28[%c0_97, %c0_98] : memref<1x96xf32, #tpu.memory_space<vmem>>, vector<1x96xf32>
    %cst_99 = arith.constant dense<0.000000e+00> : vector<2x96xf32>
    %158 = tpu.matmul %155, %156, %cst_99 {dimension_numbers = #tpu.dot_dimension_numbers<[1], [0], [0], [1], [0, 0, 1, 1], [], []>} : vector<2x32xf32>, vector<32x96xf32>, vector<2x96xf32> -> vector<2x96xf32>
    %159 = vector.broadcast %157 : vector<1x96xf32> to vector<2x96xf32>
    %160 = arith.addf %158, %159 : vector<2x96xf32>
    %161 = vector.extract_strided_slice %154 {offsets = [0, 0], sizes = [2, 32], strides = [1, 1]} : vector<2x96xf32> to vector<2x32xf32>
    %162 = vector.extract_strided_slice %160 {offsets = [0, 0], sizes = [2, 32], strides = [1, 1]} : vector<2x96xf32> to vector<2x32xf32>
    %163 = arith.addf %161, %162 : vector<2x32xf32>
    %164 = arith.negf %163 : vector<2x32xf32>
    %165 = math.exp %164 : vector<2x32xf32>
    %cst_100 = arith.constant 1.000000e+00 : f32
    %166 = vector.broadcast %cst_100 : f32 to vector<2x32xf32>
    %167 = arith.addf %166, %165 : vector<2x32xf32>
    %168 = arith.divf %166, %167 : vector<2x32xf32>
    %169 = vector.extract_strided_slice %154 {offsets = [0, 32], sizes = [2, 32], strides = [1, 1]} : vector<2x96xf32> to vector<2x32xf32>
    %170 = vector.extract_strided_slice %160 {offsets = [0, 32], sizes = [2, 32], strides = [1, 1]} : vector<2x96xf32> to vector<2x32xf32>
    %171 = arith.addf %169, %170 : vector<2x32xf32>
    %172 = arith.negf %171 : vector<2x32xf32>
    %173 = math.exp %172 : vector<2x32xf32>
    %cst_101 = arith.constant 1.000000e+00 : f32
    %174 = vector.broadcast %cst_101 : f32 to vector<2x32xf32>
    %175 = arith.addf %174, %173 : vector<2x32xf32>
    %176 = arith.divf %174, %175 : vector<2x32xf32>
    %177 = vector.extract_strided_slice %154 {offsets = [0, 64], sizes = [2, 32], strides = [1, 1]} : vector<2x96xf32> to vector<2x32xf32>
    %178 = vector.extract_strided_slice %160 {offsets = [0, 64], sizes = [2, 32], strides = [1, 1]} : vector<2x96xf32> to vector<2x32xf32>
    %179 = arith.mulf %168, %178 : vector<2x32xf32>
    %180 = arith.addf %177, %179 : vector<2x32xf32>
    %181 = math.tanh %180 : vector<2x32xf32>
    %cst_102 = arith.constant 1.000000e+00 : f32
    %182 = vector.broadcast %cst_102 : f32 to vector<2x32xf32>
    %183 = arith.subf %182, %176 : vector<2x32xf32>
    %184 = arith.mulf %183, %181 : vector<2x32xf32>
    %185 = arith.mulf %176, %155 : vector<2x32xf32>
    %186 = arith.addf %184, %185 : vector<2x32xf32>
    %c0_103 = arith.constant 0 : index
    %c0_104 = arith.constant 0 : index
    %187 = vector.load %arg37[%c0_103, %c0_104] : memref<2x32xf32, #tpu.memory_space<vmem>>, vector<2x32xf32>
    tpu.vector_store %arg37[%c0_103, %c0_104], %186 {strides = array<i32>} : memref<2x32xf32, #tpu.memory_space<vmem>>, vector<2x32xf32>,
    %188 = arith.addf %149, %186 : vector<2x32xf32>
    %c0_105 = arith.constant 0 : index
    %c0_106 = arith.constant 0 : index
    %189 = vector.load %arg29[%c0_105, %c0_106] : memref<32x32xf32, #tpu.memory_space<vmem>>, vector<32x32xf32>
    %cst_107 = arith.constant dense<0.000000e+00> : vector<2x32xf32>
    %190 = tpu.matmul %188, %189, %cst_107 {dimension_numbers = #tpu.dot_dimension_numbers<[1], [0], [0], [1], [0, 0, 1, 1], [], []>} : vector<2x32xf32>, vector<32x32xf32>, vector<2x32xf32> -> vector<2x32xf32>
    %c0_108 = arith.constant 0 : index
    %c0_109 = arith.constant 0 : index
    %191 = vector.load %arg30[%c0_108, %c0_109] : memref<32x32xf32, #tpu.memory_space<vmem>>, vector<32x32xf32>
    %cst_110 = arith.constant dense<0.000000e+00> : vector<2x32xf32>
    %192 = tpu.matmul %101, %191, %cst_110 {dimension_numbers = #tpu.dot_dimension_numbers<[1], [0], [0], [1], [0, 0, 1, 1], [], []>} : vector<2x32xf32>, vector<32x32xf32>, vector<2x32xf32> -> vector<2x32xf32>
    %193 = arith.addf %190, %192 : vector<2x32xf32>
    %c0_111 = arith.constant 0 : index
    %c0_112 = arith.constant 0 : index
    %194 = vector.load %arg31[%c0_111, %c0_112] : memref<1x32xf32, #tpu.memory_space<vmem>>, vector<1x32xf32>
    %195 = vector.broadcast %194 : vector<1x32xf32> to vector<2x32xf32>
    %196 = arith.addf %193, %195 : vector<2x32xf32>
    %c0_113 = arith.constant 0 : index
    %c0_114 = arith.constant 0 : index
    %c0_115 = arith.constant 0 : index
    %197 = vector.load %arg32[%c0_113, %c0_114, %c0_115] : memref<1x2x32xf32, #tpu.memory_space<vmem>>, vector<1x2x32xf32>
    %198 = vector.shape_cast %197 : vector<1x2x32xf32> to vector<2x32xf32>
    %199 = vector.shape_cast %196 : vector<2x32xf32> to vector<1x2x32xf32>
    tpu.vector_store %arg32[%c0_113, %c0_114, %c0_115], %199 {strides = array<i32>} : memref<1x2x32xf32, #tpu.memory_space<vmem>>, vector<1x2x32xf32>,
    %c0_116 = arith.constant 0 : index
    %c0_117 = arith.constant 0 : index
    %200 = vector.load %arg39[%c0_116, %c0_117] : memref<2x32xf32, #tpu.memory_space<vmem>>, vector<2x32xf32>
    tpu.vector_store %arg39[%c0_116, %c0_117], %196 {strides = array<i32>} : memref<2x32xf32, #tpu.memory_space<vmem>>, vector<2x32xf32>,
    return
  }
  func.func @transform_0(%arg0: i32) -> (i32, i32, i32) {
    %c0_i32 = arith.constant 0 : i32
    %c0_i32_0 = arith.constant 0 : i32
    %c0_i32_1 = arith.constant 0 : i32
    return %arg0, %c0_i32, %c0_i32_0 : i32, i32, i32
  }
  func.func @transform_1(%arg0: i32) -> (i32, i32, i32) {
    %c0_i32 = arith.constant 0 : i32
    %c0_i32_0 = arith.constant 0 : i32
    %c0_i32_1 = arith.constant 0 : i32
    %c0_i32_2 = arith.constant 0 : i32
    return %c0_i32, %c0_i32_0, %c0_i32_1 : i32, i32, i32
  }
  func.func @transform_2(%arg0: i32) -> (i32, i32) {
    %c0_i32 = arith.constant 0 : i32
    %c0_i32_0 = arith.constant 0 : i32
    %c0_i32_1 = arith.constant 0 : i32
    return %c0_i32, %c0_i32_0 : i32, i32
  }
  func.func @transform_3(%arg0: i32) -> (i32, i32) {
    %c0_i32 = arith.constant 0 : i32
    %c0_i32_0 = arith.constant 0 : i32
    %c0_i32_1 = arith.constant 0 : i32
    return %c0_i32, %c0_i32_0 : i32, i32
  }
  func.func @transform_4(%arg0: i32) -> (i32, i32) {
    %c0_i32 = arith.constant 0 : i32
    %c0_i32_0 = arith.constant 0 : i32
    %c0_i32_1 = arith.constant 0 : i32
    return %c0_i32, %c0_i32_0 : i32, i32
  }
  func.func @transform_5(%arg0: i32) -> (i32, i32) {
    %c0_i32 = arith.constant 0 : i32
    %c0_i32_0 = arith.constant 0 : i32
    %c0_i32_1 = arith.constant 0 : i32
    return %c0_i32, %c0_i32_0 : i32, i32
  }
  func.func @transform_6(%arg0: i32) -> (i32, i32) {
    %c0_i32 = arith.constant 0 : i32
    %c0_i32_0 = arith.constant 0 : i32
    %c0_i32_1 = arith.constant 0 : i32
    return %c0_i32, %c0_i32_0 : i32, i32
  }
  func.func @transform_7(%arg0: i32) -> (i32, i32) {
    %c0_i32 = arith.constant 0 : i32
    %c0_i32_0 = arith.constant 0 : i32
    %c0_i32_1 = arith.constant 0 : i32
    return %c0_i32, %c0_i32_0 : i32, i32
  }
  func.func @transform_8(%arg0: i32) -> (i32, i32) {
    %c0_i32 = arith.constant 0 : i32
    %c0_i32_0 = arith.constant 0 : i32
    %c0_i32_1 = arith.constant 0 : i32
    return %c0_i32, %c0_i32_0 : i32, i32
  }
  func.func @transform_9(%arg0: i32) -> (i32, i32) {
    %c0_i32 = arith.constant 0 : i32
    %c0_i32_0 = arith.constant 0 : i32
    %c0_i32_1 = arith.constant 0 : i32
    return %c0_i32, %c0_i32_0 : i32, i32
  }
  func.func @transform_10(%arg0: i32) -> (i32, i32) {
    %c0_i32 = arith.constant 0 : i32
    %c0_i32_0 = arith.constant 0 : i32
    %c0_i32_1 = arith.constant 0 : i32
    return %c0_i32, %c0_i32_0 : i32, i32
  }
  func.func @transform_11(%arg0: i32) -> (i32, i32) {
    %c0_i32 = arith.constant 0 : i32
    %c0_i32_0 = arith.constant 0 : i32
    %c0_i32_1 = arith.constant 0 : i32
    return %c0_i32, %c0_i32_0 : i32, i32
  }
  func.func @transform_12(%arg0: i32) -> (i32, i32) {
    %c0_i32 = arith.constant 0 : i32
    %c0_i32_0 = arith.constant 0 : i32
    %c0_i32_1 = arith.constant 0 : i32
    return %c0_i32, %c0_i32_0 : i32, i32
  }
  func.func @transform_13(%arg0: i32) -> (i32, i32) {
    %c0_i32 = arith.constant 0 : i32
    %c0_i32_0 = arith.constant 0 : i32
    %c0_i32_1 = arith.constant 0 : i32
    return %c0_i32, %c0_i32_0 : i32, i32
  }
  func.func @transform_14(%arg0: i32) -> (i32, i32) {
    %c0_i32 = arith.constant 0 : i32
    %c0_i32_0 = arith.constant 0 : i32
    %c0_i32_1 = arith.constant 0 : i32
    return %c0_i32, %c0_i32_0 : i32, i32
  }
  func.func @transform_15(%arg0: i32) -> (i32, i32) {
    %c0_i32 = arith.constant 0 : i32
    %c0_i32_0 = arith.constant 0 : i32
    %c0_i32_1 = arith.constant 0 : i32
    return %c0_i32, %c0_i32_0 : i32, i32
  }
  func.func @transform_16(%arg0: i32) -> (i32, i32) {
    %c0_i32 = arith.constant 0 : i32
    %c0_i32_0 = arith.constant 0 : i32
    %c0_i32_1 = arith.constant 0 : i32
    return %c0_i32, %c0_i32_0 : i32, i32
  }
  func.func @transform_17(%arg0: i32) -> (i32, i32) {
    %c0_i32 = arith.constant 0 : i32
    %c0_i32_0 = arith.constant 0 : i32
    %c0_i32_1 = arith.constant 0 : i32
    return %c0_i32, %c0_i32_0 : i32, i32
  }
  func.func @transform_18(%arg0: i32) -> (i32, i32) {
    %c0_i32 = arith.constant 0 : i32
    %c0_i32_0 = arith.constant 0 : i32
    %c0_i32_1 = arith.constant 0 : i32
    return %c0_i32, %c0_i32_0 : i32, i32
  }
  func.func @transform_19(%arg0: i32) -> (i32, i32) {
    %c0_i32 = arith.constant 0 : i32
    %c0_i32_0 = arith.constant 0 : i32
    %c0_i32_1 = arith.constant 0 : i32
    return %c0_i32, %c0_i32_0 : i32, i32
  }
  func.func @transform_20(%arg0: i32) -> (i32, i32) {
    %c0_i32 = arith.constant 0 : i32
    %c0_i32_0 = arith.constant 0 : i32
    %c0_i32_1 = arith.constant 0 : i32
    return %c0_i32, %c0_i32_0 : i32, i32
  }
  func.func @transform_21(%arg0: i32) -> (i32, i32) {
    %c0_i32 = arith.constant 0 : i32
    %c0_i32_0 = arith.constant 0 : i32
    %c0_i32_1 = arith.constant 0 : i32
    return %c0_i32, %c0_i32_0 : i32, i32
  }
  func.func @transform_22(%arg0: i32) -> (i32, i32) {
    %c0_i32 = arith.constant 0 : i32
    %c0_i32_0 = arith.constant 0 : i32
    %c0_i32_1 = arith.constant 0 : i32
    return %c0_i32, %c0_i32_0 : i32, i32
  }
  func.func @transform_23(%arg0: i32) -> (i32, i32) {
    %c0_i32 = arith.constant 0 : i32
    %c0_i32_0 = arith.constant 0 : i32
    %c0_i32_1 = arith.constant 0 : i32
    return %c0_i32, %c0_i32_0 : i32, i32
  }
  func.func @transform_24(%arg0: i32) -> (i32, i32) {
    %c0_i32 = arith.constant 0 : i32
    %c0_i32_0 = arith.constant 0 : i32
    %c0_i32_1 = arith.constant 0 : i32
    return %c0_i32, %c0_i32_0 : i32, i32
  }
  func.func @transform_25(%arg0: i32) -> (i32, i32) {
    %c0_i32 = arith.constant 0 : i32
    %c0_i32_0 = arith.constant 0 : i32
    %c0_i32_1 = arith.constant 0 : i32
    return %c0_i32, %c0_i32_0 : i32, i32
  }
  func.func @transform_26(%arg0: i32) -> (i32, i32) {
    %c0_i32 = arith.constant 0 : i32
    %c0_i32_0 = arith.constant 0 : i32
    %c0_i32_1 = arith.constant 0 : i32
    return %c0_i32, %c0_i32_0 : i32, i32
  }
  func.func @transform_27(%arg0: i32) -> (i32, i32) {
    %c0_i32 = arith.constant 0 : i32
    %c0_i32_0 = arith.constant 0 : i32
    %c0_i32_1 = arith.constant 0 : i32
    return %c0_i32, %c0_i32_0 : i32, i32
  }
  func.func @transform_28(%arg0: i32) -> (i32, i32) {
    %c0_i32 = arith.constant 0 : i32
    %c0_i32_0 = arith.constant 0 : i32
    %c0_i32_1 = arith.constant 0 : i32
    return %c0_i32, %c0_i32_0 : i32, i32
  }
  func.func @transform_29(%arg0: i32) -> (i32, i32) {
    %c0_i32 = arith.constant 0 : i32
    %c0_i32_0 = arith.constant 0 : i32
    %c0_i32_1 = arith.constant 0 : i32
    return %c0_i32, %c0_i32_0 : i32, i32
  }
  func.func @transform_30(%arg0: i32) -> (i32, i32) {
    %c0_i32 = arith.constant 0 : i32
    %c0_i32_0 = arith.constant 0 : i32
    %c0_i32_1 = arith.constant 0 : i32
    return %c0_i32, %c0_i32_0 : i32, i32
  }
  func.func @transform_31(%arg0: i32) -> (i32, i32, i32) {
    %c0_i32 = arith.constant 0 : i32
    %c0_i32_0 = arith.constant 0 : i32
    %c0_i32_1 = arith.constant 0 : i32
    return %arg0, %c0_i32, %c0_i32_0 : i32, i32, i32
  }
  func.func @transform_32(%arg0: i32) -> (i32, i32, i32) {
    %c0_i32 = arith.constant 0 : i32
    %c0_i32_0 = arith.constant 0 : i32
    %c0_i32_1 = arith.constant 0 : i32
    return %arg0, %c0_i32, %c0_i32_0 : i32, i32, i32
  }
}

</mosaic_0001>

<bundles_post_ra>
// kernel: tpu_custom_call.1
= control target key start
LH: loop header
LB: loop body
LE: loop exit
PB: predicated region body
PF: predicated region fallthrough
CT: control target
= control target key end

     0   :  { %s3676_s6 = smov 1   ;;  %s3677_s10 = smov 2   ;;  %s4441_s0 = inlined_call_operand.smem [shape: u32[33], index: -1, kind: input, shape index: {}] }
   0x1   :  { %s3743_s5 = sld [smem:[%s4441_s0]]   ;;  %s3678_s14 = smov 3  }
   0x2   :  { %s3748_s9 = sld [smem:[%s4441_s0 + %s3676_s6]]   ;;  %s3679_s18 = smov 4  }
   0x3   :  { %s3753_s13 = sld [smem:[%s4441_s0 + %s3677_s10]]   ;;  %s3680_s22 = smov 5  }
   0x4   :  { %s3758_s17 = sld [smem:[%s4441_s0 + %s3678_s14]]   ;;  %s3681_s26 = smov 6  }
   0x5   :  { %s3763_s21 = sld [smem:[%s4441_s0 + %s3679_s18]]   ;;  %s3682_s30 = smov 7  }
   0x6   :  { %s3768_s25 = sld [smem:[%s4441_s0 + %s3680_s22]]   ;;  %s3683_s4 = smov 8  }
   0x7   :  { %4481 = sst [smem:[#allocation60_spill]] %s3743_s5  ;;  %s3684_s10 = smov 9  }
   0x8   :  { %4482 = sst [smem:[#allocation61_spill]] %s3748_s9  ;;  %s3685_s15 = smov 10  }
   0x9   :  { %4483 = sst [smem:[#allocation62_spill]] %s3753_s13  ;;  %s3686_s20 = smov 11  }
   0xa   :  { %4484 = sst [smem:[#allocation63_spill]] %s3758_s17  ;;  %s3688_s1 = smov 13  }
   0xb   :  { %s3773_s29 = sld [smem:[%s4441_s0 + %s3681_s26]]   ;;  %s3687_s26 = smov 12  }
   0xc   :  { %s3778_s3 = sld [smem:[%s4441_s0 + %s3682_s30]]   ;;  %s3689_s7 = smov 14  }
   0xd   :  { %s3783_s8 = sld [smem:[%s4441_s0 + %s3683_s4]]   ;;  %s3691_s22 = smov 16  }
   0xe   :  { %s3788_s14 = sld [smem:[%s4441_s0 + %s3684_s10]]   ;;  %s3692_s28 = smov 17  }
   0xf   :  { %s3793_s19 = sld [smem:[%s4441_s0 + %s3685_s15]]   ;;  %s3690_s15 = smov 15  }
  0x10   :  { %s3798_s24 = sld [smem:[%s4441_s0 + %s3686_s20]]  }
  0x11   :  { %s3803_s30 = sld [smem:[%s4441_s0 + %s3687_s26]]  }
  0x12   :  { %4485 = sst [smem:[#allocation64_spill]] %s3778_s3 }
  0x13   :  { %4486 = sst [smem:[#allocation65_spill]] %s3783_s8 }
  0x14   :  { %4487 = sst [smem:[#allocation66_spill]] %s3788_s14 }
  0x15   :  { %s3808_s6 = sld [smem:[%s4441_s0 + %s3688_s1]]  }
  0x16   :  { %s3813_s12 = sld [smem:[%s4441_s0 + %s3689_s7]]   ;;  %s3693_s7 = smov 18  }
  0x17   :  { %4488 = sst [smem:[#allocation67_spill]] %s3803_s30 }
  0x18   :  { %s3818_s20 = sld [smem:[%s4441_s0 + %s3690_s15]]   ;;  %s3694_s15 = smov 19  }
  0x19   :  { %s3823_s27 = sld [smem:[%s4441_s0 + %s3691_s22]]   ;;  %s3695_s22 = smov 20  }
  0x1a   :  { %s3828_s4 = sld [smem:[%s4441_s0 + %s3692_s28]]   ;;  %s3696_s28 = smov 21  }
  0x1b   :  { %4489 = sst [smem:[#allocation68_spill]] %s3808_s6 }
  0x1c   :  { %4490 = sst [smem:[#allocation69_spill]] %s3813_s12 }
  0x1d   :  { %s3833_s3 = sld [smem:[%s4441_s0 + %s3693_s7]]   ;;  %s3697_s7 = smov 22  }
  0x1e   :  { %s3838_s17 = sld [smem:[%s4441_s0 + %s3694_s15]]   ;;  %s3698_s15 = smov 23  }
  0x1f   :  { %4491 = sst [smem:[#allocation70_spill]] %s3823_s27 }
  0x20   :  { %4492 = sst [smem:[#allocation71_spill]] %s3828_s4 }
  0x21   :  { %s3843_s5 = sld [smem:[%s4441_s0 + %s3695_s22]]   ;;  %s3699_s22 = smov 24  }
  0x22   :  { %s3848_s4 = sld [smem:[%s4441_s0 + %s3696_s28]]   ;;  %s3700_s28 = smov 25  }
  0x23   :  { %4493 = sst [smem:[#allocation72_spill]] %s3833_s3 }
  0x24   :  { %4494 = sst [smem:[#allocation73_spill]] %s3838_s17 }
  0x25   :  { %s3853_s27 = sld [smem:[%s4441_s0 + %s3697_s7]]   ;;  %s3701_s7 = smov 26  }
  0x26   :  { %s3858_s17 = sld [smem:[%s4441_s0 + %s3698_s15]]   ;;  %s3702_s15 = smov 27  }
  0x27   :  { %4495 = sst [smem:[#allocation74_spill]] %s3843_s5 }
  0x28   :  { %4496 = sst [smem:[#allocation75_spill]] %s3848_s4 }
  0x29   :  { %s3863_s5 = sld [smem:[%s4441_s0 + %s3699_s22]]   ;;  %s3703_s22 = smov 28  }
  0x2a   :  { %s3868_s12 = sld [smem:[%s4441_s0 + %s3700_s28]]   ;;  %s3704_s28 = smov 29  }
  0x2b   :  { %4497 = sst [smem:[#allocation76_spill]] %s3853_s27 }
  0x2c   :  { %4498 = sst [smem:[#allocation77_spill]] %s3858_s17 }
  0x2d   :  { %s3873_s27 = sld [smem:[%s4441_s0 + %s3701_s7]]   ;;  %s3705_s7 = smov 30  }
  0x2e   :  { %s3878_s17 = sld [smem:[%s4441_s0 + %s3702_s15]]   ;;  %s3706_s15 = smov 31  }
  0x2f   :  { %4499 = sst [smem:[#allocation78_spill]] %s3863_s5 }
  0x30   :  { %4500 = sst [smem:[#allocation79_spill]] %s3868_s12 }
  0x31   :  { %s3883_s5 = sld [smem:[%s4441_s0 + %s3703_s22]]   ;;  %s3707_s22 = smov 32  }
  0x32   :  { %s3888_s30 = sld [smem:[%s4441_s0 + %s3704_s28]]  }
  0x33   :  { %4501 = sst [smem:[#allocation80_spill]] %s3873_s27 }
  0x34   :  { %4502 = sst [smem:[#allocation81_spill]] %s3878_s17 }
  0x35   :  { %s3893_s27 = sld [smem:[%s4441_s0 + %s3705_s7]]  }
  0x36   :  { %s3898_s17 = sld [smem:[%s4441_s0 + %s3706_s15]]  }
  0x37   :  { %4503 = sst [smem:[#allocation82_spill]] %s3883_s5 }
  0x38   :  { %s3903_s5 = sld [smem:[%s4441_s0 + %s3707_s22]]  }
  0x3b   :  { %4504 = sst [smem:[#allocation83_spill]] %s3893_s27 }
  0x3c   :  { %4505 = sst [smem:[#allocation84_spill]] %s3898_s17 }
  0x3e   :  { %4506 = sst [smem:[#allocation85_spill]] %s3903_s5 }
  0x3f   :  { %71 = vsyncpa [#allocation9], 0 }
  0x40   :  { %73 = vsyncpa [#allocation9 + $0x1], 0 }
  0x41   :  { %74 = vsyncpa [#allocation12], 0 }
  0x42   :  { %75 = vsyncpa [#allocation15], 0 }
  0x43   :  { %76 = vsyncpa [#allocation18], 0 }
  0x44   :  { %77 = vsyncpa [#allocation21], 0 }
  0x45   :  { %78 = vsyncpa [#allocation24], 0 }
  0x46   :  { %79 = vsyncpa [#allocation27], 0 }
  0x47   :  { %80 = vsyncpa [#allocation30], 0 }
  0x48   :  { %81 = vsyncpa [#allocation33], 0 }
  0x49   :  { %82 = vsyncpa [#allocation36], 0 }
  0x4a   :  { %83 = vsyncpa [#allocation39], 0 }
  0x4b   :  { %84 = vsyncpa [#allocation42], 0 }
  0x4c   :  { %85 = vsyncpa [#allocation10], 0 }
  0x4d   :  { %87 = vsyncpa [#allocation10 + $0x1], 0 }
  0x4e   :  { %88 = vsyncpa [#allocation45], 0 }
  0x4f   :  { %90 = vsyncpa [#allocation45 + $0x1], 0  ;;  %s3905_s28 = smov 0   ;;  %s3907_s0 = smov 0  }
  0x50   :  { %s3909_s1 = smov 0   ;;  %s3911_s2 = smov 0  }
  0x51 LB: > { %s4507_s14 = sld [smem:[#allocation66_spill]]  ;;  %s3929_s10 = sadd.s32 4294967295, %s3674_s2   ;;  %s3674_s2 = sphi %s3911_s2, %s4577_s2   ;;  %s3670_s1 = sphi %s3909_s1, %s4576_s1   ;;  %s3666_s0 = sphi %s3907_s0, %s4575_s0   ;;  %s3662_s28 = sphi %s3905_s28, %s4574_s28  }
  0x52   : > { %s4508_s13 = sld [smem:[#allocation62_spill]]  ;;  %p2454_p0 = scmp.ge.s32.totalorder %s3674_s2, 1 }
  0x53   : > { %s4509_s12 = sld [smem:[#allocation79_spill]]  ;;  %p4473_p1 = scmp.eq.s32.totalorder %s3929_s10, 0 }
  0x54   : > { %s4510_s8 = sld [smem:[#allocation65_spill]]  ;;  %p809_p2 = scmp.lt.s32.totalorder %s3674_s2, 5 }
  0x55   : > { %s4511_s6 = sld [smem:[#allocation68_spill]]  ;;  %s3708_s15 = smov [#allocation11]  }
  0x56   : > { %s4512_s4 = sld [smem:[#allocation75_spill]]  ;;  %p3935_p4 = pnand %p2454_p0, %p809_p2 }
  0x57   : > { %s4513_s3 = sld [smem:[#allocation72_spill]]  ;;  %s822_s16 = sshll.u32 %s3708_s15, 4  ;;  %s823_s16 = int_to_ptr.vmem [resolvable:$true] %s822_s16 }
  0x58   : > { %s4514_s9 = sld [smem:[#allocation61_spill]]  ;;  %p2620_p5 = pneg %p3935_p4 }
  0x59   : > { %4515 = sst [smem:[#allocation86_spill]] %s3929_s10  ;;  %s850_s18 = sshll.u32 %s3763_s21, 4  ;;  %s3948_s18 = int_to_ptr.hbm [resolvable:$true] %s850_s18 }
  0x5a   : > { %s4516_s11 = scalar_select %p3935_p4, 1, 0 }
  0x5b   : > { %p3944_p6 = pnand %p2620_p5, %p4473_p1  ;;  %s876_s23 = sshll.u32 %s3773_s29, 4  ;;  %s3971_s23 = int_to_ptr.hbm [resolvable:$true] %s876_s23 }
  0x5c   : > { %4517 = sst [smem:[#allocation87_spill]] %s4516_s11  ;;  %s3709_s26 = smov [#allocation14]  }
  0x5d   : > { %s3951_s27 = sshll.u32 %s3709_s26, 4  ;;  %p3956_p8 = pneg %p3944_p6  ;;  %s853_s27 = int_to_ptr.vmem [resolvable:$true] %s3951_s27 }
  0x5e   : > { %s820_s7 = sshll.u32 %s4514_s9, 4  ;;  %s2879_s11 = scalar_lea.hbm %s4514_s9, 16  ;;  %s3926_s7 = int_to_ptr.hbm [resolvable:$true] %s820_s7 }
  0x5f   : > { %s2872_s17 = sshra.s32 %s3926_s7, 4  ;;  %s2873_s17 = int_to_ptr.hbm [resolvable:$true] %s2872_s17 }
  0x60   : > { %s2874_s15 = scalar_lea.hbm %s2873_s17, 16  ;;  %p2880_p11 = scmp.lt.s32.totalorder %s2873_s17, %s4514_s9 }
  0x61   : > { %p2875_p7 = scmp.ne.s32.totalorder %s2873_s17, %s2874_s15  ;;  %p2881_p12 = scmp.lt.s32.totalorder %s2879_s11, %s2874_s15 }
  0x63   : > { %p2877_p9 = pnand %p3956_p8, %p2875_p7  ;;  %p2882_p13 = por %p2881_p12, %p2880_p11 }
  0x65   : > { %p2878_p10 = pneg %p2877_p9 }
  0x67   : > { %p2883_p0 = pnand %p2882_p13, %p2878_p10 }
  0x69   : > { %2886 = shalt.err (!%p2883_p0)
}
  0x6a   : > { %s4458_s26 = smov 128   ;;  %s4461_s10 = smov 8  }
  0x6b   : > { %2623 = dma.hbm_to_vmem [thread:$0]  (!%p3944_p6), %s3926_s7, 256, %s823_s16, [#allocation12], %s4458_s26, %s4458_s26, %s4461_s10  }
  0x6c   : > { %s2902_s17 = sshra.s32 %s3948_s18, 4  ;;  %s2909_s15 = scalar_lea.hbm %s3763_s21, 1  ;;  %s2903_s17 = int_to_ptr.hbm [resolvable:$true] %s2902_s17 }
  0x6d   : > { %s2904_s11 = scalar_lea.hbm %s2903_s17, 1  ;;  %p2910_p9 = scmp.lt.s32.totalorder %s2903_s17, %s3763_s21 }
  0x6e   : > { %p2905_p2 = scmp.ne.s32.totalorder %s2903_s17, %s2904_s11  ;;  %p2911_p10 = scmp.lt.s32.totalorder %s2909_s15, %s2904_s11 }
  0x70   : > { %p2907_p5 = pnand %p2905_p2, %p3956_p8  ;;  %p2912_p11 = por %p2911_p10, %p2910_p9 }
  0x72   : > { %p2908_p7 = pneg %p2907_p5 }
  0x74   : > { %p2913_p12 = pnand %p2912_p11, %p2908_p7 }
  0x76   : > { %2916 = shalt.err (!%p2913_p12)
}
  0x77   : > { %2629 = dma.hbm_to_vmem [thread:$0]  (!%p3944_p6), %s3948_s18, 16, %s853_s27, [#allocation15]  }
  0x78   : > { %s902_s7 = sshll.u32 %s4507_s14, 4  ;;  %s3712_s16 = smov [#allocation17]   ;;  %s3982_s7 = int_to_ptr.hbm [resolvable:$true] %s902_s7 }
  0x79   : > { %s878_s26 = sshll.u32 %s3712_s16, 4  ;;  %s2932_s17 = sshra.s32 %s3971_s23, 4  ;;  %s879_s26 = int_to_ptr.vmem [resolvable:$true] %s878_s26  ;;  %s2933_s17 = int_to_ptr.hbm [resolvable:$true] %s2932_s17 }
  0x7a   : > { %s2934_s11 = scalar_lea.hbm %s2933_s17, 1  ;;  %s2939_s15 = scalar_lea.hbm %s3773_s29, 1 }
  0x7b   : > { %p2935_p13 = scmp.ne.s32.totalorder %s2933_s17, %s2934_s11  ;;  %p2940_p5 = scmp.lt.s32.totalorder %s2933_s17, %s3773_s29 }
  0x7c   : > { %p2941_p7 = scmp.lt.s32.totalorder %s2939_s15, %s2934_s11 }
  0x7d   : > { %p2937_p0 = pnand %p2935_p13, %p3956_p8 }
  0x7e   : > { %p2942_p9 = por %p2941_p7, %p2940_p5 }
  0x7f   : > { %p2938_p2 = pneg %p2937_p0 }
  0x81   : > { %p2943_p10 = pnand %p2942_p9, %p2938_p2 }
  0x83   : > { %2946 = shalt.err (!%p2943_p10)
}
  0x84   : > { %2635 = dma.hbm_to_vmem [thread:$0]  (!%p3944_p6), %s3971_s23, 16, %s879_s26, [#allocation18]  }
  0x85   : > { %s3713_s27 = smov [#allocation20]   ;;  %s930_s16 = sshll.u32 %s3798_s24, 4  ;;  %s3993_s16 = int_to_ptr.hbm [resolvable:$true] %s930_s16 }
  0x86   : > { %s904_s18 = sshll.u32 %s3713_s27, 4  ;;  %s2962_s17 = sshra.s32 %s3982_s7, 4  ;;  %s905_s18 = int_to_ptr.vmem [resolvable:$true] %s904_s18  ;;  %s2963_s17 = int_to_ptr.hbm [resolvable:$true] %s2962_s17 }
  0x87   : > { %s2964_s11 = scalar_lea.hbm %s2963_s17, 16  ;;  %s2969_s15 = scalar_lea.hbm %s4507_s14, 16 }
  0x88   : > { %p2965_p11 = scmp.ne.s32.totalorder %s2963_s17, %s2964_s11  ;;  %p2970_p0 = scmp.lt.s32.totalorder %s2963_s17, %s4507_s14 }
  0x89   : > { %p2971_p2 = scmp.lt.s32.totalorder %s2969_s15, %s2964_s11 }
  0x8a   : > { %p2967_p12 = pnand %p2965_p11, %p3956_p8 }
  0x8b   : > { %p2972_p5 = por %p2971_p2, %p2970_p0 }
  0x8c   : > { %p2968_p13 = pneg %p2967_p12 }
  0x8e   : > { %p2973_p7 = pnand %p2972_p5, %p2968_p13 }
  0x90   : > { %2976 = shalt.err (!%p2973_p7)
}
  0x91   : > { %s4520_s23 = smov 128   ;;  %s957_s26 = sshll.u32 %s4511_s6, 4  ;;  %s4007_s26 = int_to_ptr.hbm [resolvable:$true] %s957_s26 }
  0x92   : > { %2641 = dma.hbm_to_vmem [thread:$0]  (!%p3944_p6), %s3982_s7, 256, %s905_s18, [#allocation21], %s4520_s23, %s4520_s23, %s4461_s10  }
  0x93   : > { %s3714_s27 = smov [#allocation23]   ;;  %s2992_s17 = sshra.s32 %s3993_s16, 4  ;;  %s2993_s17 = int_to_ptr.hbm [resolvable:$true] %s2992_s17 }
  0x94   : > { %s932_s9 = sshll.u32 %s3714_s27, 4  ;;  %s2994_s11 = scalar_lea.hbm %s2993_s17, 32  ;;  %s933_s9 = int_to_ptr.vmem [resolvable:$true] %s932_s9 }
  0x95   : > { %p2995_p9 = scmp.ne.s32.totalorder %s2993_s17, %s2994_s11  ;;  %s2999_s15 = scalar_lea.hbm %s3798_s24, 32 }
  0x96   : > { %p3000_p12 = scmp.lt.s32.totalorder %s2993_s17, %s3798_s24  ;;  %p3001_p13 = scmp.lt.s32.totalorder %s2999_s15, %s2994_s11 }
  0x97   : > { %p2997_p10 = pnand %p2995_p9, %p3956_p8 }
  0x98   : > { %p3002_p0 = por %p3001_p13, %p3000_p12 }
  0x99   : > { %p2998_p11 = pneg %p2997_p10 }
  0x9b   : > { %p3003_p2 = pnand %p3002_p0, %p2998_p11 }
  0x9d   : > { %3006 = shalt.err (!%p3003_p2)
}
  0x9e   : > { %2647 = dma.hbm_to_vmem [thread:$0]  (!%p3944_p6), %s3993_s16, 512, %s933_s9, [#allocation24], %s4520_s23, %s4520_s23, %s4461_s10  }
  0x9f   : > { %s3715_s7 = smov [#allocation26]   ;;  %s983_s27 = sshll.u32 %s3818_s20, 4  ;;  %s4021_s27 = int_to_ptr.hbm [resolvable:$true] %s983_s27 }
  0xa0   : > { %s959_s18 = sshll.u32 %s3715_s7, 4  ;;  %s3022_s17 = sshra.s32 %s4007_s26, 4  ;;  %s960_s18 = int_to_ptr.vmem [resolvable:$true] %s959_s18  ;;  %s3023_s17 = int_to_ptr.hbm [resolvable:$true] %s3022_s17 }
  0xa1   : > { %s3024_s11 = scalar_lea.hbm %s3023_s17, 1  ;;  %s3029_s15 = scalar_lea.hbm %s4511_s6, 1 }
  0xa2   : > { %p3025_p5 = scmp.ne.s32.totalorder %s3023_s17, %s3024_s11  ;;  %p3030_p10 = scmp.lt.s32.totalorder %s3023_s17, %s4511_s6 }
  0xa3   : > { %p3031_p11 = scmp.lt.s32.totalorder %s3029_s15, %s3024_s11 }
  0xa4   : > { %p3027_p7 = pnand %p3025_p5, %p3956_p8 }
  0xa5   : > { %p3032_p12 = por %p3031_p11, %p3030_p10 }
  0xa6   : > { %p3028_p9 = pneg %p3027_p7 }
  0xa8   : > { %p3033_p13 = pnand %p3032_p12, %p3028_p9 }
  0xaa   : > { %3036 = shalt.err (!%p3033_p13)
}
  0xab   : > { %2653 = dma.hbm_to_vmem [thread:$0]  (!%p3944_p6), %s4007_s26, 16, %s960_s18, [#allocation27]  }
  0xac   : > { %s1009_s9 = sshll.u32 %s4513_s3, 4  ;;  %s3716_s16 = smov [#allocation29]   ;;  %s4032_s9 = int_to_ptr.hbm [resolvable:$true] %s1009_s9 }
  0xad   : > { %s985_s7 = sshll.u32 %s3716_s16, 4  ;;  %s3052_s17 = sshra.s32 %s4021_s27, 4  ;;  %s986_s7 = int_to_ptr.vmem [resolvable:$true] %s985_s7  ;;  %s3053_s17 = int_to_ptr.hbm [resolvable:$true] %s3052_s17 }
  0xae   : > { %s3054_s11 = scalar_lea.hbm %s3053_s17, 1  ;;  %s3059_s15 = scalar_lea.hbm %s3818_s20, 1 }
  0xaf   : > { %p3055_p0 = scmp.ne.s32.totalorder %s3053_s17, %s3054_s11  ;;  %p3060_p7 = scmp.lt.s32.totalorder %s3053_s17, %s3818_s20 }
  0xb0   : > { %p3061_p9 = scmp.lt.s32.totalorder %s3059_s15, %s3054_s11 }
  0xb1   : > { %p3057_p2 = pnand %p3055_p0, %p3956_p8 }
  0xb2   : > { %p3062_p10 = por %p3061_p9, %p3060_p7 }
  0xb3   : > { %p3058_p5 = pneg %p3057_p2 }
  0xb5   : > { %p3063_p11 = pnand %p3062_p10, %p3058_p5 }
  0xb7   : > { %3066 = shalt.err (!%p3063_p11)
}
  0xb8   : > { %2659 = dma.hbm_to_vmem [thread:$0]  (!%p3944_p6), %s4021_s27, 16, %s986_s7, [#allocation30]  }
  0xb9   : > { %s3717_s26 = smov [#allocation32]   ;;  %s1040_s16 = sshll.u32 %s4512_s4, 4  ;;  %s4043_s16 = int_to_ptr.hbm [resolvable:$true] %s1040_s16 }
  0xba   : > { %s1011_s18 = sshll.u32 %s3717_s26, 4  ;;  %s3082_s17 = sshra.s32 %s4032_s9, 4  ;;  %s1012_s18 = int_to_ptr.vmem [resolvable:$true] %s1011_s18  ;;  %s3083_s17 = int_to_ptr.hbm [resolvable:$true] %s3082_s17 }
  0xbb   : > { %s3084_s11 = scalar_lea.hbm %s3083_s17, 32  ;;  %s3089_s15 = scalar_lea.hbm %s4513_s3, 32 }
  0xbc   : > { %p3085_p12 = scmp.ne.s32.totalorder %s3083_s17, %s3084_s11  ;;  %p3090_p2 = scmp.lt.s32.totalorder %s3083_s17, %s4513_s3 }
  0xbd   : > { %p3091_p5 = scmp.lt.s32.totalorder %s3089_s15, %s3084_s11 }
  0xbe   : > { %p3087_p13 = pnand %p3085_p12, %p3956_p8 }
  0xbf   : > { %p3092_p7 = por %p3091_p5, %p3090_p2 }
  0xc0   : > { %p3088_p0 = pneg %p3087_p13 }
  0xc2   : > { %p3093_p9 = pnand %p3092_p7, %p3088_p0 }
  0xc4   : > { %3096 = shalt.err (!%p3093_p9)
}
  0xc5   : > { %2665 = dma.hbm_to_vmem [thread:$0]  (!%p3944_p6), %s4032_s9, 512, %s1012_s18, [#allocation33], %s4520_s23, %s4520_s23, %s4461_s10  }
  0xc6   : > { %s1074_s27 = sshll.u32 %s4509_s12, 4  ;;  %s3718_s7 = smov [#allocation35]   ;;  %s4057_s27 = int_to_ptr.hbm [resolvable:$true] %s1074_s27 }
  0xc7   : > { %s1042_s26 = sshll.u32 %s3718_s7, 4  ;;  %s3112_s17 = sshra.s32 %s4043_s16, 4  ;;  %s1043_s26 = int_to_ptr.vmem [resolvable:$true] %s1042_s26  ;;  %s3113_s17 = int_to_ptr.hbm [resolvable:$true] %s3112_s17 }
  0xc8   : > { %s3114_s11 = scalar_lea.hbm %s3113_s17, 32  ;;  %s3119_s15 = scalar_lea.hbm %s4512_s4, 32 }
  0xc9   : > { %p3115_p10 = scmp.ne.s32.totalorder %s3113_s17, %s3114_s11  ;;  %p3120_p13 = scmp.lt.s32.totalorder %s3113_s17, %s4512_s4 }
  0xca   : > { %p3121_p0 = scmp.lt.s32.totalorder %s3119_s15, %s3114_s11 }
  0xcb   : > { %p3117_p11 = pnand %p3115_p10, %p3956_p8 }
  0xcc   : > { %p3122_p2 = por %p3121_p0, %p3120_p13 }
  0xcd   : > { %p3118_p12 = pneg %p3117_p11 }
  0xcf   : > { %p3123_p5 = pnand %p3122_p2, %p3118_p12 }
  0xd1   : > { %3126 = shalt.err (!%p3123_p5)
}
  0xd2   : > { %2671 = dma.hbm_to_vmem [thread:$0]  (!%p3944_p6), %s4043_s16, 512, %s1043_s26, [#allocation36], %s4520_s23, %s4520_s23, %s4461_s10  }
  0xd3   : > { %s3719_s9 = smov [#allocation38]   ;;  %s835_s7 = sshll.u32 %s4508_s13, 4  ;;  %s4071_s7 = int_to_ptr.hbm [resolvable:$true] %s835_s7 }
  0xd4   : > { %s1076_s18 = sshll.u32 %s3719_s9, 4  ;;  %s3142_s17 = sshra.s32 %s4057_s27, 4  ;;  %s1077_s18 = int_to_ptr.vmem [resolvable:$true] %s1076_s18  ;;  %s3143_s17 = int_to_ptr.hbm [resolvable:$true] %s3142_s17 }
  0xd5   : > { %s3144_s11 = scalar_lea.hbm %s3143_s17, 32  ;;  %s3149_s15 = scalar_lea.hbm %s4509_s12, 32 }
  0xd6   : > { %p3145_p7 = scmp.ne.s32.totalorder %s3143_s17, %s3144_s11  ;;  %p3150_p11 = scmp.lt.s32.totalorder %s3143_s17, %s4509_s12 }
  0xd7   : > { %p3151_p12 = scmp.lt.s32.totalorder %s3149_s15, %s3144_s11 }
  0xd8   : > { %p3147_p9 = pnand %p3145_p7, %p3956_p8 }
  0xd9   : > { %p3152_p13 = por %p3151_p12, %p3150_p11 }
  0xda   : > { %p3148_p10 = pneg %p3147_p9 }
  0xdc   : > { %p3153_p0 = pnand %p3152_p13, %p3148_p10 }
  0xde   : > { %3156 = shalt.err (!%p3153_p0)
}
  0xdf   : > { %2677 = dma.hbm_to_vmem [thread:$0]  (!%p3944_p6), %s4057_s27, 512, %s1077_s18, [#allocation39], %s4520_s23, %s4520_s23, %s4461_s10  }
  0xe0   : > { %s861_s16 = sshll.u32 %s3768_s25, 4  ;;  %s3720_s26 = smov [#allocation13]   ;;  %s4085_s16 = int_to_ptr.hbm [resolvable:$true] %s861_s16 }
  0xe1   : > { %s837_s9 = sshll.u32 %s3720_s26, 4  ;;  %s3172_s17 = sshra.s32 %s4071_s7, 4  ;;  %s838_s9 = int_to_ptr.vmem [resolvable:$true] %s837_s9  ;;  %s3173_s17 = int_to_ptr.hbm [resolvable:$true] %s3172_s17 }
  0xe2   : > { %s3174_s11 = scalar_lea.hbm %s3173_s17, 2  ;;  %s3179_s15 = scalar_lea.hbm %s4508_s13, 2 }
  0xe3   : > { %p3175_p2 = scmp.ne.s32.totalorder %s3173_s17, %s3174_s11  ;;  %p3180_p9 = scmp.lt.s32.totalorder %s3173_s17, %s4508_s13 }
  0xe4   : > { %p3181_p10 = scmp.lt.s32.totalorder %s3179_s15, %s3174_s11 }
  0xe5   : > { %p3177_p5 = pnand %p3175_p2, %p3956_p8 }
  0xe6   : > { %p3182_p11 = por %p3181_p10, %p3180_p9 }
  0xe7   : > { %p3178_p7 = pneg %p3177_p5 }
  0xe9   : > { %p3183_p12 = pnand %p3182_p11, %p3178_p7 }
  0xeb   : > { %3186 = shalt.err (!%p3183_p12)
}
  0xec   : > { %2626 = dma.hbm_to_vmem [thread:$0]  (!%p3944_p6), %s4071_s7, 32, %s838_s9, [#allocation12]  }
  0xed   : > { %s3721_s27 = smov [#allocation16]   ;;  %s891_s26 = sshll.u32 %s4510_s8, 4  ;;  %s4096_s26 = int_to_ptr.hbm [resolvable:$true] %s891_s26 }
  0xee   : > { %s863_s18 = sshll.u32 %s3721_s27, 4  ;;  %s3202_s17 = sshra.s32 %s4085_s16, 4  ;;  %s864_s18 = int_to_ptr.vmem [resolvable:$true] %s863_s18  ;;  %s3203_s17 = int_to_ptr.hbm [resolvable:$true] %s3202_s17 }
  0xef   : > { %s3204_s11 = scalar_lea.hbm %s3203_s17, 32  ;;  %s3209_s15 = scalar_lea.hbm %s3768_s25, 32 }
  0xf0   : > { %p3205_p13 = scmp.ne.s32.totalorder %s3203_s17, %s3204_s11  ;;  %p3210_p5 = scmp.lt.s32.totalorder %s3203_s17, %s3768_s25 }
  0xf1   : > { %p3211_p7 = scmp.lt.s32.totalorder %s3209_s15, %s3204_s11 }
  0xf2   : > { %p3207_p0 = pnand %p3205_p13, %p3956_p8 }
  0xf3   : > { %p3212_p9 = por %p3211_p7, %p3210_p5 }
  0xf4   : > { %p3208_p2 = pneg %p3207_p0 }
  0xf6   : > { %p3213_p10 = pnand %p3212_p9, %p3208_p2 }
  0xf8   : > { %3216 = shalt.err (!%p3213_p10)
}
  0xf9   : > { %2632 = dma.hbm_to_vmem [thread:$0]  (!%p3944_p6), %s4085_s16, 512, %s864_s18, [#allocation15], %s4520_s23, %s4520_s23, %s4461_s10  }
  0xfa   : > { %s916_s7 = sshll.u32 %s3793_s19, 4  ;;  %s3722_s9 = smov [#allocation19]   ;;  %s4110_s7 = int_to_ptr.hbm [resolvable:$true] %s916_s7 }
  0xfb   : > { %s893_s27 = sshll.u32 %s3722_s9, 4  ;;  %s3232_s17 = sshra.s32 %s4096_s26, 4  ;;  %s894_s27 = int_to_ptr.vmem [resolvable:$true] %s893_s27  ;;  %s3233_s17 = int_to_ptr.hbm [resolvable:$true] %s3232_s17 }
  0xfc   : > { %s3234_s11 = scalar_lea.hbm %s3233_s17, 1  ;;  %s3239_s15 = scalar_lea.hbm %s4510_s8, 1 }
  0xfd   : > { %p3235_p11 = scmp.ne.s32.totalorder %s3233_s17, %s3234_s11  ;;  %p3240_p0 = scmp.lt.s32.totalorder %s3233_s17, %s4510_s8 }
  0xfe   : > { %p3241_p2 = scmp.lt.s32.totalorder %s3239_s15, %s3234_s11 }
  0xff   : > { %p3237_p12 = pnand %p3235_p11, %p3956_p8 }
 0x100   : > { %p3242_p5 = por %p3241_p2, %p3240_p0 }
 0x101   : > { %p3238_p13 = pneg %p3237_p12 }
 0x103   : > { %p3243_p7 = pnand %p3242_p5, %p3238_p13 }
 0x105   : > { %3246 = shalt.err (!%p3243_p7)
}
 0x106   : > { %s4521_s16 = sld [smem:[#allocation67_spill]]  ;;  %s3723_s18 = smov [#allocation22]  }
 0x107   : > { %2638 = dma.hbm_to_vmem [thread:$0]  (!%p3944_p6), %s4096_s26, 16, %s894_s27, [#allocation18]  }
 0x108   : > { %s918_s9 = sshll.u32 %s3723_s18, 4  ;;  %s3262_s17 = sshra.s32 %s4110_s7, 4  ;;  %s919_s9 = int_to_ptr.vmem [resolvable:$true] %s918_s9  ;;  %s3263_s17 = int_to_ptr.hbm [resolvable:$true] %s3262_s17 }
 0x109   : > { %s3264_s11 = scalar_lea.hbm %s3263_s17, 32  ;;  %s3269_s15 = scalar_lea.hbm %s3793_s19, 32 }
 0x10a   : > { %p3265_p9 = scmp.ne.s32.totalorder %s3263_s17, %s3264_s11  ;;  %p3270_p12 = scmp.lt.s32.totalorder %s3263_s17, %s3793_s19 }
 0x10b   : > { %p3271_p13 = scmp.lt.s32.totalorder %s3269_s15, %s3264_s11 }
 0x10c   : > { %s945_s10 = sshll.u32 %s4521_s16, 4  ;;  %p3267_p10 = pnand %p3265_p9, %p3956_p8  ;;  %s4121_s10 = int_to_ptr.hbm [resolvable:$true] %s945_s10 }
 0x10d   : > { %p3272_p0 = por %p3271_p13, %p3270_p12 }
 0x10e   : > { %p3268_p11 = pneg %p3267_p10 }
 0x110   : > { %p3273_p2 = pnand %p3272_p0, %p3268_p11 }
 0x112   : > { %3276 = shalt.err (!%p3273_p2)
}
 0x113   : > { %s4522_s26 = smov 8   ;;  %s4523_s27 = sld [smem:[#allocation69_spill]] }
 0x114   : > { %2644 = dma.hbm_to_vmem [thread:$0]  (!%p3944_p6), %s4110_s7, 512, %s919_s9, [#allocation21], %s4520_s23, %s4520_s23, %s4522_s26  }
 0x115   : > { %s3724_s3 = smov [#allocation25]   ;;  %s3292_s17 = sshra.s32 %s4121_s10, 4  ;;  %s3293_s17 = int_to_ptr.hbm [resolvable:$true] %s3292_s17 }
 0x116   : > { %s947_s4 = sshll.u32 %s3724_s3, 4  ;;  %s3294_s11 = scalar_lea.hbm %s3293_s17, 1  ;;  %s948_s4 = int_to_ptr.vmem [resolvable:$true] %s947_s4 }
 0x117   : > { %p3295_p5 = scmp.ne.s32.totalorder %s3293_s17, %s3294_s11  ;;  %s3299_s15 = scalar_lea.hbm %s4521_s16, 1 }
 0x118   : > { %p3300_p10 = scmp.lt.s32.totalorder %s3293_s17, %s4521_s16  ;;  %p3301_p11 = scmp.lt.s32.totalorder %s3299_s15, %s3294_s11 }
 0x119   : > { %s968_s18 = sshll.u32 %s4523_s27, 4  ;;  %p3297_p7 = pnand %p3295_p5, %p3956_p8  ;;  %s4135_s18 = int_to_ptr.hbm [resolvable:$true] %s968_s18 }
 0x11a   : > { %p3302_p12 = por %p3301_p11, %p3300_p10 }
 0x11b   : > { %p3298_p9 = pneg %p3297_p7 }
 0x11d   : > { %p3303_p13 = pnand %p3302_p12, %p3298_p9 }
 0x11f   : > { %3306 = shalt.err (!%p3303_p13)
}
 0x120   : > { %s4524_s3 = sld [smem:[#allocation70_spill]]  ;;  %s3725_s7 = smov [#allocation28]  }
 0x121   : > { %2650 = dma.hbm_to_vmem [thread:$0]  (!%p3944_p6), %s4121_s10, 16, %s948_s4, [#allocation24]  }
 0x122   : > { %s970_s9 = sshll.u32 %s3725_s7, 4  ;;  %s3322_s17 = sshra.s32 %s4135_s18, 4  ;;  %s971_s9 = int_to_ptr.vmem [resolvable:$true] %s970_s9  ;;  %s3323_s17 = int_to_ptr.hbm [resolvable:$true] %s3322_s17 }
 0x123   : > { %s3324_s11 = scalar_lea.hbm %s3323_s17, 32  ;;  %s3329_s15 = scalar_lea.hbm %s4523_s27, 32 }
 0x124   : > { %p3325_p0 = scmp.ne.s32.totalorder %s3323_s17, %s3324_s11  ;;  %p3330_p7 = scmp.lt.s32.totalorder %s3323_s17, %s4523_s27 }
 0x125   : > { %p3331_p9 = scmp.lt.s32.totalorder %s3329_s15, %s3324_s11 }
 0x126   : > { %s995_s6 = sshll.u32 %s4524_s3, 4  ;;  %p3327_p2 = pnand %p3325_p0, %p3956_p8  ;;  %s4146_s6 = int_to_ptr.hbm [resolvable:$true] %s995_s6 }
 0x127   : > { %p3332_p10 = por %p3331_p9, %p3330_p7 }
 0x128   : > { %p3328_p5 = pneg %p3327_p2 }
 0x12a   : > { %p3333_p11 = pnand %p3332_p10, %p3328_p5 }
 0x12c   : > { %3336 = shalt.err (!%p3333_p11)
}
 0x12d   : > { %s4525_s4 = sld [smem:[#allocation74_spill]]  ;;  %s3726_s7 = smov [#allocation31]  }
 0x12e   : > { %2656 = dma.hbm_to_vmem [thread:$0]  (!%p3944_p6), %s4135_s18, 512, %s971_s9, [#allocation27], %s4520_s23, %s4520_s23, %s4522_s26  }
 0x12f   : > { %s997_s8 = sshll.u32 %s3726_s7, 4  ;;  %s3352_s17 = sshra.s32 %s4146_s6, 4  ;;  %s998_s8 = int_to_ptr.vmem [resolvable:$true] %s997_s8  ;;  %s3353_s17 = int_to_ptr.hbm [resolvable:$true] %s3352_s17 }
 0x130   : > { %s3354_s11 = scalar_lea.hbm %s3353_s17, 1  ;;  %s3359_s15 = scalar_lea.hbm %s4524_s3, 1 }
 0x131   : > { %p3355_p12 = scmp.ne.s32.totalorder %s3353_s17, %s3354_s11  ;;  %p3360_p2 = scmp.lt.s32.totalorder %s3353_s17, %s4524_s3 }
 0x132   : > { %p3361_p5 = scmp.lt.s32.totalorder %s3359_s15, %s3354_s11 }
 0x133   : > { %s1026_s10 = sshll.u32 %s4525_s4, 4  ;;  %p3357_p13 = pnand %p3355_p12, %p3956_p8  ;;  %s4160_s10 = int_to_ptr.hbm [resolvable:$true] %s1026_s10 }
 0x134   : > { %p3362_p7 = por %p3361_p5, %p3360_p2 }
 0x135   : > { %p3358_p0 = pneg %p3357_p13 }
 0x137   : > { %p3363_p9 = pnand %p3362_p7, %p3358_p0 }
 0x139   : > { %3366 = shalt.err (!%p3363_p9)
}
 0x13a   : > { %s4526_s18 = sld [smem:[#allocation78_spill]]  ;;  %s3727_s9 = smov [#allocation34]  }
 0x13b   : > { %2662 = dma.hbm_to_vmem [thread:$0]  (!%p3944_p6), %s4146_s6, 16, %s998_s8, [#allocation30]  }
 0x13c   : > { %s1028_s7 = sshll.u32 %s3727_s9, 4  ;;  %s3382_s17 = sshra.s32 %s4160_s10, 4  ;;  %s1029_s7 = int_to_ptr.vmem [resolvable:$true] %s1028_s7  ;;  %s3383_s17 = int_to_ptr.hbm [resolvable:$true] %s3382_s17 }
 0x13d   : > { %s3384_s11 = scalar_lea.hbm %s3383_s17, 32  ;;  %s3389_s15 = scalar_lea.hbm %s4525_s4, 32 }
 0x13e   : > { %p3385_p10 = scmp.ne.s32.totalorder %s3383_s17, %s3384_s11  ;;  %p3390_p13 = scmp.lt.s32.totalorder %s3383_s17, %s4525_s4 }
 0x13f   : > { %p3391_p0 = scmp.lt.s32.totalorder %s3389_s15, %s3384_s11 }
 0x140   : > { %s1060_s12 = sshll.u32 %s4526_s18, 4  ;;  %p3387_p11 = pnand %p3385_p10, %p3956_p8  ;;  %s4171_s12 = int_to_ptr.hbm [resolvable:$true] %s1060_s12 }
 0x141   : > { %p3392_p2 = por %p3391_p0, %p3390_p13 }
 0x142   : > { %p3388_p12 = pneg %p3387_p11 }
 0x144   : > { %p3393_p5 = pnand %p3392_p2, %p3388_p12 }
 0x146   : > { %3396 = shalt.err (!%p3393_p5)
}
 0x147   : > { %s4527_s8 = sld [smem:[#allocation82_spill]]  ;;  %s3728_s9 = smov [#allocation37]  }
 0x148   : > { %2668 = dma.hbm_to_vmem [thread:$0]  (!%p3944_p6), %s4160_s10, 512, %s1029_s7, [#allocation33], %s4520_s23, %s4520_s23, %s4522_s26  }
 0x149   : > { %s1062_s3 = sshll.u32 %s3728_s9, 4  ;;  %s3412_s17 = sshra.s32 %s4171_s12, 4  ;;  %s1063_s3 = int_to_ptr.vmem [resolvable:$true] %s1062_s3  ;;  %s3413_s17 = int_to_ptr.hbm [resolvable:$true] %s3412_s17 }
 0x14a   : > { %s3414_s11 = scalar_lea.hbm %s3413_s17, 32  ;;  %s3419_s15 = scalar_lea.hbm %s4526_s18, 32 }
 0x14b   : > { %p3415_p7 = scmp.ne.s32.totalorder %s3413_s17, %s3414_s11  ;;  %p3420_p11 = scmp.lt.s32.totalorder %s3413_s17, %s4526_s18 }
 0x14c   : > { %p3421_p12 = scmp.lt.s32.totalorder %s3419_s15, %s3414_s11 }
 0x14d   : > { %s1094_s6 = sshll.u32 %s4527_s8, 4  ;;  %p3417_p9 = pnand %p3415_p7, %p3956_p8  ;;  %s4185_s6 = int_to_ptr.hbm [resolvable:$true] %s1094_s6 }
 0x14e   : > { %p3422_p13 = por %p3421_p12, %p3420_p11 }
 0x14f   : > { %p3418_p10 = pneg %p3417_p9 }
 0x151   : > { %p3423_p0 = pnand %p3422_p13, %p3418_p10 }
 0x153   : > { %3426 = shalt.err (!%p3423_p0)
}
 0x154   : > { %2674 = dma.hbm_to_vmem [thread:$0]  (!%p3944_p6), %s4171_s12, 512, %s1063_s3, [#allocation36], %s4520_s23, %s4520_s23, %s4522_s26  }
 0x155   : > { %s3729_s10 = smov [#allocation40]   ;;  %s1108_s9 = sshll.u32 %s3888_s30, 4  ;;  %s4199_s9 = int_to_ptr.hbm [resolvable:$true] %s1108_s9 }
 0x156   : > { %s1096_s7 = sshll.u32 %s3729_s10, 4  ;;  %s3442_s17 = sshra.s32 %s4185_s6, 4  ;;  %s1097_s7 = int_to_ptr.vmem [resolvable:$true] %s1096_s7  ;;  %s3443_s17 = int_to_ptr.hbm [resolvable:$true] %s3442_s17 }
 0x157   : > { %s3444_s11 = scalar_lea.hbm %s3443_s17, 32  ;;  %s3449_s15 = scalar_lea.hbm %s4527_s8, 32 }
 0x158   : > { %p3445_p2 = scmp.ne.s32.totalorder %s3443_s17, %s3444_s11  ;;  %p3450_p9 = scmp.lt.s32.totalorder %s3443_s17, %s4527_s8 }
 0x159   : > { %p3451_p10 = scmp.lt.s32.totalorder %s3449_s15, %s3444_s11 }
 0x15a   : > { %p3447_p5 = pnand %p3445_p2, %p3956_p8 }
 0x15b   : > { %p3452_p11 = por %p3451_p10, %p3450_p9 }
 0x15c   : > { %p3448_p7 = pneg %p3447_p5 }
 0x15e   : > { %p3453_p12 = pnand %p3452_p11, %p3448_p7 }
 0x160   : > { %3456 = shalt.err (!%p3453_p12)
}
 0x161   : > { %2680 = dma.hbm_to_vmem [thread:$0]  (!%p3944_p6), %s4185_s6, 512, %s1097_s7, [#allocation39], %s4520_s23, %s4520_s23, %s4522_s26  }
 0x162   : > { %s3730_s12 = smov [#allocation41]   ;;  %s3472_s10 = sshra.s32 %s4199_s9, 4  ;;  %s3473_s10 = int_to_ptr.hbm [resolvable:$true] %s3472_s10 }
 0x163   : > { %s1110_s3 = sshll.u32 %s3730_s12, 4  ;;  %s3474_s17 = scalar_lea.hbm %s3473_s10, 32  ;;  %s1111_s3 = int_to_ptr.vmem [resolvable:$true] %s1110_s3 }
 0x164   : > { %p3475_p13 = scmp.ne.s32.totalorder %s3473_s10, %s3474_s17  ;;  %s3479_s11 = scalar_lea.hbm %s3888_s30, 32 }
 0x165   : > { %p3480_p5 = scmp.lt.s32.totalorder %s3473_s10, %s3888_s30  ;;  %p3481_p7 = scmp.lt.s32.totalorder %s3479_s11, %s3474_s17 }
 0x166   : > { %p3477_p0 = pnand %p3475_p13, %p3956_p8 }
 0x167   : > { %p3482_p9 = por %p3481_p7, %p3480_p5 }
 0x168   : > { %p3478_p2 = pneg %p3477_p0 }
 0x16a   : > { %p3483_p10 = pnand %p3482_p9, %p3478_p2 }
 0x16c   : > { %3486 = shalt.err (!%p3483_p10)
}
 0x16d   : > { %s4528_s5 = sld [smem:[#allocation86_spill]]  ;;  %s2453_s6 = sadd.s32 4294967294, %s3674_s2  }
 0x16e   : > { %2683 = dma.hbm_to_vmem [thread:$0]  (!%p3944_p6), %s4199_s9, 512, %s1111_s3, [#allocation42], %s4520_s23, %s4520_s23, %s4522_s26  }
 0x16f   : > { %s4225_s22 = sadd.s32 1, %s3674_s2   ;;  %s103_s7 = sadd.s32 1, %s3670_s1 }
 0x170   : > { %s100_s15 = ssub.s32 %s3674_s2, %s4225_s22  ;;  %s4529_s12 = sld [smem:[#allocation60_spill]] }
 0x171   : > { %p110_p8 = scmp.ne.s32.totalorder %s3670_s1, %s3666_s0  ;;  %p101_p11 = scmp.eq.s32.totalorder %s100_s15, 0 }
 0x172   : > { %p111_p12 = scmp.eq.s32.totalorder %s3674_s2, 0  ;;  %p116_p13 = scmp.ne.s32.totalorder %s3666_s0, %s3662_s28 }
 0x173   : > { %p770_p0 = scmp.eq.s32.totalorder %s4528_s5, 3  ;;  %p776_p5 = scmp.eq.s32.totalorder %s2453_s6, 3 }
 0x174   : > { %s4237_s10 = scalar_select %p101_p11, %s3670_s1, %s103_s7  }
 0x175   : > { %p4241_p2 = por %p4473_p1, %p116_p13  ;;  %p4245_p6 = por %p770_p0, %p110_p8 }
 0x176   : > { %p112_p7 = por %p111_p12, %p110_p8  ;;  %s1127_s26 = sand.u32 1, %s3670_s1  }
 0x177   : > { %p4250_p9 = por %p776_p5, %p116_p13  ;;  %p2716_p10 = scmp.lt.s32.totalorder %s3674_s2, 4 }
 0x178   : > { %s2477_s3 = sshll.u32 %s1127_s26, 1  ;;  %s2478_s11 = sshll.u32 %s3674_s2, 1 }
 0x179   : > { %s4532_s9 = scalar_select %p4250_p9, 1, 0 }
 0x17a   : > { %s1135_s5 = scalar_lea.hbm %s4529_s12, %s2478_s11  ;;  %s1131_s15 = scalar_lea.vmem [#allocation8], %s2477_s3 }
 0x17b   : > { %s1137_s7 = sshll.u32 %s1135_s5, 4  ;;  %s1139_s4 = sshll.u32 %s1131_s15, 4  ;;  %s1138_s7 = int_to_ptr.hbm [resolvable:$true] %s1137_s7  ;;  %s1140_s4 = int_to_ptr.vmem [resolvable:$true] %s1139_s4 }
 0x17c   : > { %p4257_p11 = pnand %p2716_p10, %p112_p7  ;;  %s1128_s6 = scalar_lea.sflag [#allocation9], %s1127_s26 }
 0x17d   : > { %s3502_s13 = sshra.s32 %s1138_s7, 4  ;;  %s3509_s11 = scalar_lea.hbm %s4529_s12, 8  ;;  %s3503_s13 = int_to_ptr.hbm [resolvable:$true] %s3502_s13 }
 0x17e   : > { %s3504_s14 = scalar_lea.hbm %s3503_s13, 2  ;;  %p3506_p12 = pneg %p4257_p11 }
 0x17f   : > { %p3505_p8 = scmp.ne.s32.totalorder %s3503_s13, %s3504_s14  ;;  %p3510_p5 = scmp.lt.s32.totalorder %s3503_s13, %s4529_s12 }
 0x180   : > { %p3511_p3 = scmp.lt.s32.totalorder %s3509_s11, %s3504_s14 }
 0x181   : > { %p3507_p13 = pnand %p3506_p12, %p3505_p8 }
 0x182   : > { %p3512_p1 = por %p3511_p3, %p3510_p5 }
 0x183   : > { %p3508_p0 = pneg %p3507_p13 }
 0x185   : > { %p3513_p9 = pnand %p3512_p1, %p3508_p0 }
 0x187   : > { %3516 = shalt.err (!%p3513_p9)
}
 0x188   : > { %2687 = dma.hbm_to_vmem [thread:$0]  (!%p4257_p11), %s1138_s7, 32, %s1140_s4, %s1128_s6  }
 0x189   : > { %1148 = sbr.rel (%p3935_p4) target bundleno = 3393 (0xd41), region = 144  ;;  %s4270_s26 = sand.u32 (!%p3935_p4), 1, %s3666_s0  }
 0x18a   : > { %s4273_s5 = sshll.u32 (!%p3935_p4), %s4270_s26, 1  ;;  %s1151_s13 = scalar_lea.sflag (!%p3935_p4), [#allocation9], %s4270_s26 }
 0x18b   : > { %s1154_s14 = scalar_lea.vmem (!%p3935_p4), [#allocation8], %s4273_s5 }
 0x18e   : > { %3605 = dma.done.wait (%p4241_p2), %s1151_s13, 32  }
 0x18f   : > { %3607 = vsyncadd (%p4241_p2), %s1151_s13, 4294967264  ;;  %s4535_s4 = sld [smem:[#allocation86_spill]] }
 0x195   : > { %p4536_p1 = scmp.eq.s32.totalorder %s4535_s4, 0 }
 0x197   : > { %3609 = dma.done.wait (%p4536_p1), [#allocation12], 288   ;;  %p4537_p3 = pmov %p4536_p1 }
 0x198   : > { %p4538_p4 = pmov %p4536_p1 }
 0x199   : > { %3611 = vsyncadd (%p4537_p3), [#allocation12], 4294967008 }
 0x19a   : > { %3613 = dma.done.wait (%p4538_p4), [#allocation15], 528   ;;  %p4539_p7 = pmov %p4536_p1 }
 0x19b   : > { %p4540_p9 = pmov %p4536_p1 }
 0x19c   : > { %3615 = vsyncadd (%p4539_p7), [#allocation15], 4294966768 }
 0x19d   : > { %3617 = dma.done.wait (%p4540_p9), [#allocation18], 32   ;;  %p4541_p10 = pmov %p4536_p1 }
 0x19e   : > { %p4542_p2 = pmov %p4536_p1 }
 0x19f   : > { %3619 = vsyncadd (%p4541_p10), [#allocation18], 4294967264 }
 0x1a0   : > { %3621 = dma.done.wait (%p4542_p2), [#allocation21], 768   ;;  %p4543_p11 = pmov %p4536_p1 }
 0x1a1   : > { %p4544_p8 = pmov %p4536_p1 }
 0x1a2   : > { %3623 = vsyncadd (%p4543_p11), [#allocation21], 4294966528 }
 0x1a3   : > { %3625 = dma.done.wait (%p4544_p8), [#allocation24], 528   ;;  %p4545_p12 = pmov %p4536_p1 }
 0x1a4   : > { %p4546_p13 = pmov %p4536_p1 }
 0x1a5   : > { %3627 = vsyncadd (%p4545_p12), [#allocation24], 4294966768 }
 0x1a6   : > { %3629 = dma.done.wait (%p4546_p13), [#allocation27], 528   ;;  %p4547_p0 = pmov %p4536_p1 }
 0x1a8   : > { %3631 = vsyncadd (%p4547_p0), [#allocation27], 4294966768  ;;  %p4548_p5 = pmov %p4547_p0 }
 0x1a9   : > { %p4549_p1 = pmov %p4547_p0 }
 0x1aa   : > { %3633 = dma.done.wait (%p4548_p5), [#allocation30], 32  }
 0x1ab   : > { %3635 = vsyncadd (%p4549_p1), [#allocation30], 4294967264  ;;  %p4550_p3 = pmov %p4547_p0 }
 0x1ac   : > { %p4551_p4 = pmov %p4547_p0 }
 0x1ad   : > { %3637 = dma.done.wait (%p4550_p3), [#allocation33], 1024  }
 0x1ae   : > { %3639 = vsyncadd (%p4551_p4), [#allocation33], 4294966272  ;;  %p4552_p7 = pmov %p4547_p0 }
 0x1af   : > { %p4553_p9 = pmov %p4547_p0 }
 0x1b0   : > { %3641 = dma.done.wait (%p4552_p7), [#allocation36], 1024  }
 0x1b1   : > { %3643 = vsyncadd (%p4553_p9), [#allocation36], 4294966272  ;;  %p4554_p10 = pmov %p4547_p0 }
 0x1b2   : > { %p4555_p2 = pmov %p4547_p0 }
 0x1b3   : > { %3645 = dma.done.wait (%p4554_p10), [#allocation39], 1024  }
 0x1b4   : > { %3647 = vsyncadd (%p4555_p2), [#allocation39], 4294966272  ;;  %p4556_p11 = pmov %p4547_p0 }
 0x1b5   : > { %p4557_p8 = pmov %p4547_p0 }
 0x1b6   : > { %3649 = dma.done.wait (%p4556_p11), [#allocation42], 512  }
 0x1b7   : > { %3651 = vsyncadd (%p4557_p8), [#allocation42], 4294966784  ;;  %s1345_s17 = scalar_lea.vmem [#allocation44], %s4273_s5  ;;  %p4558_p12 = scmp.ne.s32.totalorder %s4535_s4, 0 }
 0x1b8   : > { %s4559_s7 = sld [smem:[#allocation63_spill]] (!%p4558_p12) }
 0x1b9   : > { %1349 = sbr.rel (%p4558_p12) target bundleno = 584 (0x248), region = 236 }
 0x1be   : > { %vm1350_vm0 = vcmask 254976   ;;  %v1360_v0 = vld [vmem:[%s4559_s7 + $0x18] sm:$0xff]  ;;  %v1359_v1 = vld [vmem:[%s4559_s7 + $0x10] sm:$0xff]  ;;  %v3731_v2 = vmov 0.0   ;;  %v1358_v3 = vld [vmem:[%s4559_s7 + $0x8] sm:$0xff]  ;;  %vm1365_vm1 = vcmask 261120  }
 0x1bf   : > { %1351 = vst.msk [vmem:[#allocation3] sm:$0x3] %vm1350_vm0, %v3731_v2  ;;  %1381 = vmatpush.msra.mxu0 %v1360_v0  ;;  %1415 = vmatpush.msra.mxu1 %v1360_v0  ;;  %v1357_v4 = vld [vmem:[%s4559_s7] sm:$0xff]  ;;  %v2830_v7 = vld [vmem:[#allocation14] ss:$0 sm:$0xff] }
 0x1c0   : > { %1352 = vst.msk [vmem:[#allocation4] sm:$0x3] %vm1350_vm0, %v3731_v2  ;;  %v1356_v5 = vld [vmem:[#allocation11] sm:$0xff]  ;;  %v1391_v6 = vld [vmem:[#allocation11 + $0x8] sm:$0xff]  ;;  %v2831_v8 = vld [vmem:[#allocation14] ss:$0 sm:$0xff] }
 0x1c1   : > { %1353 = vst.msk [vmem:[#allocation5] sm:$0x3] %vm1350_vm0, %v3731_v2  ;;  %1382 = vmatpush.msra.mxu0 %v1359_v1  ;;  %1416 = vmatpush.msra.mxu1 %v1359_v1 }
 0x1c2   : > { %1354 = vst.msk [vmem:[#allocation6] sm:$0x3] %vm1350_vm0, %v3731_v2 }
 0x1c3   : > { %1383 = vmatpush.msra.mxu0 %v1358_v3  ;;  %1417 = vmatpush.msra.mxu1 %v1358_v3 }
 0x1c5   : > { %1384 = vmatpush.msra.mxu0 %v1357_v4  ;;  %1418 = vmatpush.msra.mxu1 %v1357_v4 }
 0x1c6   : > { %2505 = vmatmul.msk.f32.vlgmr.msra.gmra.mxu0 %vm1365_vm1, %v1356_v5  ;;  %2506 = vmatmul.msk.f32.vlgmr.msra.gmra.mxu1 %vm1365_vm1, %v1391_v6 }
 0x243   : > { %v1386_v9 = vpop.f32.mrf.mxu0  ;;  %v1420_v10 = vpop.f32.mrf.mxu1 }
 0x244   : > { %v1387_v11 = vadd.f32 %v2830_v7, %v1386_v9  ;;  %v1421_v12 = vadd.f32 %v2831_v8, %v1420_v10 }
 0x246   : > { %1389 = vst.msk [vmem:[#allocation2] sm:$0xff] %vm1365_vm1, %v1387_v11 }
 0x247   : > { %1424 = vst.msk [vmem:[#allocation2 + $0x8] sm:$0xff] %vm1365_vm1, %v1421_v12 }
 0x248 PF: > { %v1429_v13 = vld [vmem:[#allocation16 + $0x18] sm:$0xff]  ;;  %s4560_s15 = sld [smem:[#allocation64_spill]]  ;;  %v1428_v14 = vld [vmem:[#allocation16 + $0x10] sm:$0xff]  ;;  %v1427_v15 = vld [vmem:[#allocation16 + $0x8] sm:$0xff]  ;;  %vm1434_vm2 = vcmask 261120   ;;  %vm1521_vm3 = vcmask 130048  }
 0x249   : > { %1450 = vmatpush.msra.mxu0 %v1429_v13  ;;  %v1426_v17 = vld [vmem:[#allocation16] sm:$0xff]  ;;  %v1425_v18 = vld [vmem:[%s1154_s14] sm:$0x3]  ;;  %v1497_v22 = vld [vmem:[#allocation22 + $0x18] sm:$0xff]  ;;  %s3732_s6 = smov 64   ;;  %s4561_s11 = sld [smem:[#allocation71_spill]] }
 0x24a   : > { %1513 = vmatpush.msra.mxu2 %v1497_v22  ;;  %v2834_v23 = vld [vmem:[#allocation17] ss:$0 sm:$0xff]  ;;  %v1496_v27 = vld [vmem:[#allocation22 + $0x10] sm:$0xff]  ;;  %v1493_v29 = vld [vmem:[#allocation20 + $0x8] sm:$0xff]  ;;  %s3733_s3 = smov 96   ;;  %s3734_s13 = smov 32  }
 0x24b   : > { %1451 = vmatpush.msra.mxu0 %v1428_v14  ;;  %v1495_v28 = vld [vmem:[#allocation22 + $0x8] sm:$0xff]  ;;  %1539 = vmatpush.msra.mxu3 %v1493_v29  ;;  %v1494_v30 = vld [vmem:[#allocation22] sm:$0xff]  ;;  %v1492_v31 = vld [vmem:[#allocation20] sm:$0xff]  ;;  %vm1628_vm8 = vcmask 254976   ;;  %vm1692_vm9 = vcmask 1041409   ;;  %vm1696_vm11 = vcmask 58368  }
 0x24c   : > { %1514 = vmatpush.msra.mxu2 %v1496_v27  ;;  %v1491_v32 = vld [vmem:[#allocation6] sm:$0x3]  ;;  %v1554_v33 = vld [vmem:[#allocation23 + $0x18] sm:$0xff]  ;;  %v1552_v35 = vld [vmem:[#allocation23 + $0x8] sm:$0xff]  ;;  %s4562_s14 = sld [smem:[#allocation77_spill]] }
 0x24d   : > { %1452 = vmatpush.msra.mxu0 %v1427_v15  ;;  %1540 = vmatpush.msra.mxu3 %v1492_v31  ;;  %v1553_v34 = vld [vmem:[#allocation23 + $0x10] sm:$0xff]  ;;  %v1551_v36 = vld [vmem:[#allocation23] sm:$0xff]  ;;  %v2835_v37 = vld [vmem:[#allocation19] ss:$0 sm:$0xff]  ;;  %s4563_s4 = sld [smem:[#allocation73_spill]] }
 0x24e   : > { %v1462_v16 = vld [vmem:[%s4560_s15 + $0x18] sm:$0xff]  ;;  %v1461_v19 = vld [vmem:[%s4560_s15 + $0x10] sm:$0xff]  ;;  %v1460_v20 = vld [vmem:[%s4560_s15 + $0x8] sm:$0xff]  ;;  %1515 = vmatpush.msra.mxu2 %v1495_v28  ;;  %s4564_s8 = sld [smem:[#allocation76_spill]] }
 0x24f   : > { %1482 = vmatpush.msra.mxu1 %v1462_v16  ;;  %1453 = vmatpush.msra.mxu0 %v1426_v17  ;;  %v1459_v21 = vld [vmem:[%s4560_s15] sm:$0xff]  ;;  %v1550_v41 = vld [vmem:[#allocation3] sm:$0x3]  ;;  %v1751_v6 = vld [vmem:[%s4561_s11 + $0x18] sm:$0xff] }
 0x250   : > { %2507 = vmatmul.msk.f32.vlgmr.msra.gmra.mxu0 %vm1434_vm2, %v1425_v18  ;;  %1516 = vmatpush.msra.mxu2 %v1494_v30  ;;  %v2837_v43 = vld [vmem:[#allocation26] ss:$0 sm:$0xff]  ;;  %v2836_v48 = vld [vmem:[#allocation25] ss:$0 sm:$0xff]  ;;  %v1632_v7 = vld [vmem:[#allocation28 + $0x10] sm:$0xff] }
 0x251   : > { %1483 = vmatpush.msra.mxu1 %v1461_v19  ;;  %2509 = vmatmul.msk.f32.vlgmr.msra.gmra.mxu2 %vm1434_vm2, %v1491_v32  ;;  %v1633_v5 = vld [vmem:[#allocation28 + $0x18] sm:$0xff]  ;;  %v1750_v8 = vld [vmem:[%s4561_s11 + $0x10] sm:$0xff]  ;;  %v1749_v10 = vld [vmem:[%s4561_s11 + $0x8] sm:$0xff] }
 0x252   : > { %1574 = vmatpush.msrb.mxu3 %v1554_v33  ;;  %1652 = vmatpush.msrb.mxu0 %v1633_v5  ;;  %v1631_v9 = vld [vmem:[#allocation28 + $0x8] sm:$0xff]  ;;  %v1630_v11 = vld [vmem:[#allocation28] sm:$0xff]  ;;  %v1748_v12 = vld [vmem:[%s4561_s11] sm:$0xff]  ;;  %s2089_s11 = scalar_lea.sflag [#allocation45], %s4270_s26 }
 0x253   : > { %1484 = vmatpush.msra.mxu1 %v1460_v20  ;;  %1790 = vmatpush.msrb.mxu2 %v1751_v6  ;;  %v2838_v20 = vld [vmem:[#allocation29] ss:$0 sm:$0xff]  ;;  %v2839_v30 = vld [vmem:[#allocation31] ss:$0 sm:$0xff]  ;;  %v1836_v6 = vld [vmem:[#allocation35 + $0x8] sm:$0xff] }
 0x254   : > { %1575 = vmatpush.msrb.mxu3 %v1553_v34  ;;  %1653 = vmatpush.msrb.mxu0 %v1632_v7  ;;  %v1805_v7 = vld [vmem:[#allocation34 + $0x10] sm:$0xff] }
 0x255   : > { %1485 = vmatpush.msra.mxu1 %v1459_v21  ;;  %1791 = vmatpush.msrb.mxu2 %v1750_v8  ;;  %v1835_v8 = vld [vmem:[#allocation35] sm:$0xff] }
 0x256   : > { %1576 = vmatpush.msrb.mxu3 %v1552_v35  ;;  %1654 = vmatpush.msrb.mxu0 %v1631_v9  ;;  %v4363_v9 = vld [vmem:[#allocation4] sm:$0x3] }
 0x257   : > { %1792 = vmatpush.msrb.mxu2 %v1749_v10 }
 0x258   : > { %1577 = vmatpush.msrb.mxu3 %v1551_v36  ;;  %1655 = vmatpush.msrb.mxu0 %v1630_v11 }
 0x259   : > { %1793 = vmatpush.msrb.mxu2 %v1748_v12 }
 0x2cd   : > { %v1455_v24 = vpop.f32.mrf.mxu0 }
 0x2ce   : > { %v1456_v25 = vadd.f32 %v2834_v23, %v1455_v24  ;;  %v1662_v23 = vld [vmem:[#allocation2] sm:$0xff] }
 0x2d0   : > { %v1458_v26 = vmax.f32 %v1456_v25, 0.0 }
 0x2d2   : > { %2508 = vmatmul.msk.f32.vlgmr.msra.gmra.mxu1 %vm1434_vm2, %v1458_v26  ;;  %v1663_v26 = vld [vmem:[#allocation2 + $0x8] sm:$0xff] }
 0x2d4   : > { %v1518_v46 = vpop.f32.mrf.mxu2 }
 0x34f   : > { %v1487_v38 = vpop.f32.mrf.mxu1 }
 0x350   : > { %v1488_v39 = vadd.f32 %v2835_v37, %v1487_v38  ;;  %v1688_v37 = vlaneseq }
 0x352   : > { %v1490_v40 = vmax.f32 %v1488_v39, 0.0  ;;  %v1689_v38 = vand.u32 127, %v1688_v37 }
 0x354   : > { %2510 = vmatmul.msk.f32.vlgmr.msra.gmra.mxu3 %vm1521_vm3, %v1490_v40  ;;  %v1684_v40 = vld [vmem:[#allocation13] sm:$0x3] }
 0x355   : > { %vm1685_vm10 = vcmp.gt.f32.partialorder %v1684_v40, 0.5 }
 0x35c   : > { %2511 = vmatmul.msk.f32.vlgmr.msrb.gmra.mxu3 %vm1434_vm2, %v1550_v41 }
 0x3d7   : > { %v1542_v42 = vpop.f32.mrf.mxu3 }
 0x3d8   : > { %v1543_v47 = vadd.f32 %v1542_v42, %v1518_v46 }
 0x3da   : > { %v1549_v49 = vadd.f32 %v2836_v48, %v1543_v47 }
 0x3df   : > { %v1579_v44 = vpop.f32.mrf.mxu3 }
 0x3e0   : > { %v1580_v45 = vadd.f32 %v2837_v43, %v1579_v44 }
 0x3e2   : > { %1603 = vrot.lane.b32.xlu0 %v1580_v45, %s3732_s6  ;;  %v1582_v50 = vadd.f32 %v1580_v45, %v1549_v49 }
 0x3e4   : > { %v2512_v51 = vmul.f32 -1.442695, %v1582_v50 }
 0x3e6   : > { %2846 = vpow2.f32 %v2512_v51 }
 0x3ec   : > { %v2847_v52 = vpop.eup %2846 }
 0x3ed   : > { %v1586_v53 = vadd.f32 1.0, %v2847_v52 }
 0x3ef   : > { %2848 = vrcp.f32 %v1586_v53  ;;  %v1598_v59 = vand.u32 2147483648, %v1586_v53  ;;  %vm1592_vm5 = vweird.f32 %v1586_v53  ;;  %v1596_v60 = vand.u32 2147483647, %v1586_v53 }
 0x3f1   : > { %v1599_v62 = vor.u32 1.1754944e-38, %v1598_v59  ;;  %vm1597_vm7 = vcmp.eq.f32.partialorder %v1596_v60, 8.507059e+37  ;;  %v1755_v60 = vld [vmem:[#allocation32 + $0x18] sm:$0xff] }
 0x3f2   : > { %1770 = vmatpush.msrb.mxu1 %v1755_v60 }
 0x3f5   : > { %v2849_v54 = vpop.eup %2848 }
 0x3f6   : > { %v1588_v55 = vmul.f32 %v2849_v54, %v1586_v53  ;;  %vm1593_vm4 = vweird.f32 %v2849_v54  ;;  %v1713_v53 = vshrl.u32 %v1688_v37, 7  ;;  %v2840_v37 = vld [vmem:[%s4563_s4] ss:$0 sm:$0xff]  ;;  %s4568_s4 = sld [smem:[#allocation85_spill]] }
 0x3f7   : > { %vm1594_vm6 = vmor %vm1592_vm5, %vm1593_vm4 }
 0x3f8   : > { %v1589_v56 = vsub.f32 1.0, %v1588_v55  ;;  %2833 = vset.pattern.permute.xlu0 %v1713_v53  ;;  %2832 = vset.pattern.permute.xlu2 %v1713_v53 }
 0x3fa   : > { %v1590_v57 = vmul.f32 %v2849_v54, %v1589_v56 }
 0x3fc   : > { %v1591_v58 = vadd.f32 %v2849_v54, %v1590_v57  ;;  %s3552_s15 = scalar_lea.hbm %s4568_s4, 8 }
 0x3fe   : > { %v1595_v61 = vsel %vm1594_vm6, %v2849_v54, %v1591_v58 }
 0x3ff   : > { %v1600_v0 = vsel %vm1597_vm7, %v1599_v62, %v1595_v61  ;;  %v1754_v61 = vld [vmem:[#allocation32 + $0x10] sm:$0xff]  ;;  %v1753_v62 = vld [vmem:[#allocation32 + $0x8] sm:$0xff] }
 0x400   : > { %v1613_v14 = vsub.f32 1.0, %v1600_v0  ;;  %1771 = vmatpush.msrb.mxu1 %v1754_v61 }
 0x402   : > { %1772 = vmatpush.msrb.mxu1 %v1753_v62 }
 0x454   : > { %v1604_v63 = vpop.permute.xlu0 %1603 }
 0x455   : > { %v1606_v1 = vmul.f32 %v1604_v63, %v1600_v0  ;;  %v1752_v63 = vld [vmem:[#allocation32] sm:$0xff] }
 0x456   : > { %1773 = vmatpush.msrb.mxu1 %v1752_v63 }
 0x457   : > { %1608 = vrot.lane.b32.xlu0 %v1606_v1, %s3732_s6 }
 0x4c9   : > { %v1609_v2 = vpop.permute.xlu0 %1608 }
 0x4ca   : > { %v1611_v3 = vadd.f32 %v1609_v2, %v1549_v49  ;;  %v1838_v2 = vld [vmem:[#allocation35 + $0x18] sm:$0xff] }
 0x4cb   : > { %1858 = vmatpush.msra.mxu0 %v1838_v2  ;;  %v1917_v2 = vld [vmem:[#allocation37 + $0x18] sm:$0xff] }
 0x4cc   : > { %2850 = vtanh.f32 %v1611_v3  ;;  %v1837_v3 = vld [vmem:[#allocation35 + $0x10] sm:$0xff]  ;;  %1937 = vmatpush.msra.mxu1 %v1917_v2 }
 0x4cd   : > { %1859 = vmatpush.msra.mxu0 %v1837_v3  ;;  %v1947_v3 = vld [vmem:[#allocation38 + $0x8] sm:$0xff] }
 0x4cf   : > { %1860 = vmatpush.msra.mxu0 %v1836_v6  ;;  %v1946_v6 = vld [vmem:[#allocation38] sm:$0xff] }
 0x4d1   : > { %1861 = vmatpush.msra.mxu0 %v1835_v8 }
 0x4d2   : > { %v2851_v4 = vpop.eup %2850 }
 0x4d3   : > { %1615 = vrot.lane.b32.xlu1 %v2851_v4, %s3733_s3  ;;  %v1806_v4 = vld [vmem:[#allocation34 + $0x18] sm:$0xff] }
 0x4d4   : > { %1826 = vmatpush.msra.mxu3 %v1806_v4  ;;  %v1916_v4 = vld [vmem:[#allocation37 + $0x10] sm:$0xff] }
 0x4d5   : > { %1938 = vmatpush.msra.mxu1 %v1916_v4 }
 0x4d6   : > { %1827 = vmatpush.msra.mxu3 %v1805_v7  ;;  %v1945_v7 = vld [vmem:[#allocation5] sm:$0x3] }
 0x4db   : > { %1619 = vrot.lane.b32.xlu1 %v1550_v41, %s3734_s13 }
 0x545   : > { %v1616_v13 = vpop.permute.xlu1 %1615 }
 0x546   : > { %v1618_v16 = vmul.f32 %v1616_v13, %v1613_v14  ;;  %v1726_v13 = vld [vmem:[#allocation11 + $0x8] sm:$0xff] }
 0x54d   : > { %v1620_v15 = vpop.permute.xlu1 %1619 }
 0x54e   : > { %v1622_v17 = vmul.f32 %v1620_v15, %v1600_v0  ;;  %v1725_v0 = vld [vmem:[#allocation11] sm:$0xff] }
 0x550   : > { %v1623_v18 = vadd.f32 %v1622_v17, %v1618_v16 }
 0x552   : > { %1625 = vrot.lane.b32.xlu2 %v1623_v18, %s3733_s3 }
 0x5ac   : > { %v1626_v19 = vpop.permute.xlu2 %1625 }
 0x5ad   : > { %1629 = vst.msk [vmem:[#allocation3] sm:$0x3] %vm1628_vm8, %v1626_v19  ;;  %2513 = vmatmul.msk.f32.vlgmr.msrb.gmra.mxu0 %vm1434_vm2, %v1626_v19  ;;  %2515 = vmatmul.msk.f32.vlgmr.msrb.gmra.mxu2 %vm1434_vm2, %v1626_v19 }
 0x5b5   : > { %2517 = vmatmul.msk.f32.vlgmr.msra.gmra.mxu0 %vm1434_vm2, %v4363_v9 }
 0x62a   : > { %v1657_v21 = vpop.f32.mrf.mxu0 }
 0x62b   : > { %v1658_v22 = vadd.f32 %v2838_v20, %v1657_v21 }
 0x62d   : > { %v1661_v24 = vrot.slane %v1658_v22, 1  ;;  %v1664_v25 = vperm.slane %v1658_v22, 0 }
 0x62f   : > { %v1665_v27 = vperm.slane %v1661_v24, 0  ;;  %v1668_v28 = vadd.f32 %v1664_v25, %v1662_v23 }
 0x631   : > { %v1669_v29 = vadd.f32 %v1665_v27, %v1663_v26  ;;  %2852 = vtanh.f32 %v1668_v28  ;;  %v1804_v28 = vld [vmem:[#allocation34 + $0x8] sm:$0xff] }
 0x632   : > { %1828 = vmatpush.msra.mxu3 %v1804_v28 }
 0x633   : > { %2854 = vtanh.f32 %v1669_v29  ;;  %v1803_v29 = vld [vmem:[#allocation34] sm:$0xff] }
 0x634   : > { %1829 = vmatpush.msra.mxu3 %v1803_v29 }
 0x637   : > { %v2853_v31 = vpop.eup %2852 }
 0x638   : > { %v1676_v32 = vmul.f32 %v2853_v31, %v2839_v30  ;;  %v2031_v31 = vld [vmem:[#allocation41 + $0x10] sm:$0xff] }
 0x639   : > { %v2855_v33 = vpop.eup %2854 }
 0x63a   : > { %v1678_v34 = vsel %vm1434_vm2, %v1676_v32, 0.0  ;;  %v1677_v35 = vmul.f32 %v2855_v33, %v2839_v30  ;;  %v2032_v30 = vld [vmem:[#allocation41 + $0x18] sm:$0xff]  ;;  %v2030_v32 = vld [vmem:[#allocation41 + $0x8] sm:$0xff]  ;;  %v2029_v33 = vld [vmem:[#allocation41] sm:$0xff] }
 0x63b   : > { %1679 = vadd.xlane.f32.xlu2 %v1678_v34  ;;  %2045 = vmatpush.msrb.mxu3 %v2032_v30  ;;  %v2841_v34 = vld [vmem:[%s4562_s14] ss:$0 sm:$0xff]  ;;  %s4566_s14 = sld [smem:[#allocation80_spill]] }
 0x63c   : > { %v1681_v36 = vsel %vm1434_vm2, %v1677_v35, 0.0  ;;  %v1863_v35 = vpop.f32.mrf.mxu0 }
 0x63d   : > { %1682 = vadd.xlane.f32.xlu0 %v1681_v36  ;;  %2046 = vmatpush.msrb.mxu3 %v2031_v31  ;;  %v1864_v36 = vadd.f32 %v2841_v34, %v1863_v35 }
 0x63f   : > { %2047 = vmatpush.msrb.mxu3 %v2030_v32 }
 0x641   : > { %2048 = vmatpush.msrb.mxu3 %v2029_v33 }
 0x6ae   : > { %v1680_v39 = vpop.xlane.xlu2 %1679 }
 0x6af   : > { %v1690_v42 = vperm.slane %v1680_v39, %v1689_v38 }
 0x6b0   : > { %v1683_v41 = vpop.xlane.xlu0 %1682 }
 0x6b1   : > { %v1691_v43 = vperm.slane %v1683_v41, %v1689_v38  ;;  %v1795_v38 = vpop.f32.mrf.mxu2 }
 0x6b3   : > { %v1693_v44 = vsel %vm1692_vm9, %v1691_v43, %v1690_v42  ;;  %v2842_v42 = vld [vmem:[%s4564_s8] ss:$0 sm:$0xff]  ;;  %s4565_s8 = sld [smem:[#allocation81_spill]] }
 0x6b4   : > { %v1695_v45 = vsel %vm1685_vm10, %v1693_v44, -1e+30 }
 0x6b5   : > { %v1697_v46 = vsel %vm1696_vm11, %v1695_v45, -inf }
 0x6b6   : > { %1698 = vmax.xlane.f32.xlu1 %v1697_v46 }
 0x6cf   : > { %1887 = vrot.lane.b32.xlu1 %v1864_v36, %s3732_s6 }
 0x729   : > { %v1699_v47 = vpop.xlane.xlu1 %1698 }
 0x72a   : > { %v1700_v48 = vsub.f32 %v1695_v45, %v1699_v47 }
 0x72c   : > { %v1701_v49 = vmul.f32 1.442695, %v1700_v48 }
 0x72e   : > { %2856 = vpow2.f32 %v1701_v49 }
 0x734   : > { %v2857_v50 = vpop.eup %2856 }
 0x735   : > { %v1703_v51 = vmul.f32 %v2857_v50, %v1684_v40 }
 0x737   : > { %v1704_v52 = vsel %vm1696_vm11, %v1703_v51, 0.0 }
 0x738   : > { %1705 = vadd.xlane.f32.xlu2 %v1704_v52 }
 0x7ab   : > { %v1706_v54 = vpop.xlane.xlu2 %1705 }
 0x7ac   : > { %v1707_v55 = vmax.f32 %v1706_v54, 1e-20 }
 0x7ae   : > { %2858 = vrcp.f32 %v1707_v55 }
 0x7b4   : > { %v2859_v56 = vpop.eup %2858 }
 0x7b5   : > { %v1709_v57 = vmul.f32 %v2859_v56, %v1703_v51 }
 0x7b7   : > { %1710 = vst.msk [vmem:[%s1345_s17] sm:$0x3] %vm1696_vm11, %v1709_v57  ;;  %v1718_v58 = vperm.slane %v1709_v57, 1  ;;  %v1711_v59 = vperm.slane %v1709_v57, 0  ;;  %v1888_v57 = vpop.permute.xlu1 %1887 }
 0x7b9   : > { %1723 = vperm.xlu0 %2833, %v1718_v58   ;;  %1716 = vperm.xlu2 %2832, %v1711_v59  }
 0x813   : > { %v1717_v1 = vpop.permute.xlu2 %1716 }
 0x814   : > { %v1727_v5 = vmul.f32 %v1725_v0, %v1717_v1  ;;  %v1949_v0 = vld [vmem:[#allocation38 + $0x18] sm:$0xff]  ;;  %v1948_v1 = vld [vmem:[#allocation38 + $0x10] sm:$0xff] }
 0x815   : > { %1969 = vmatpush.msra.mxu2 %v1949_v0 }
 0x816   : > { %v1729_v10 = vsel %vm1434_vm2, %v1727_v5, 0.0  ;;  %v1915_v5 = vld [vmem:[#allocation37 + $0x8] sm:$0xff] }
 0x817   : > { %v1730_v11 = vrot.slane %v1729_v10, 4  ;;  %1970 = vmatpush.msra.mxu2 %v1948_v1  ;;  %1939 = vmatpush.msra.mxu1 %v1915_v5 }
 0x819   : > { %v1731_v12 = vadd.f32 %v1730_v11, %v1729_v10  ;;  %1971 = vmatpush.msra.mxu2 %v1947_v3 }
 0x81b   : > { %v1732_v16 = vrot.slane %v1731_v12, 2  ;;  %1972 = vmatpush.msra.mxu2 %v1946_v6 }
 0x81c   : > { %2520 = vmatmul.msk.f32.vlgmr.msra.gmra.mxu2 %vm1434_vm2, %v1945_v7 }
 0x81d   : > { %v1733_v19 = vadd.f32 %v1732_v16, %v1731_v12 }
 0x81f   : > { %v1734_v22 = vrot.slane %v1733_v19, 1 }
 0x821   : > { %v1735_v25 = vadd.f32 %v1734_v22, %v1733_v19 }
 0x82b   : > { %v1724_v14 = vpop.permute.xlu0 %1723 }
 0x82c   : > { %v1728_v15 = vmul.f32 %v1726_v13, %v1724_v14  ;;  %v1914_v14 = vld [vmem:[#allocation37] sm:$0xff] }
 0x82d   : > { %1940 = vmatpush.msra.mxu1 %v1914_v14 }
 0x82e   : > { %v1736_v17 = vsel %vm1434_vm2, %v1728_v15, 0.0  ;;  %v2843_v15 = vld [vmem:[%s4565_s8] ss:$0 sm:$0xff] }
 0x82f   : > { %v1737_v18 = vrot.slane %v1736_v17, 4 }
 0x831   : > { %v1738_v20 = vadd.f32 %v1737_v18, %v1736_v17 }
 0x833   : > { %v1739_v21 = vrot.slane %v1738_v20, 2 }
 0x835   : > { %v1740_v23 = vadd.f32 %v1739_v21, %v1738_v20  ;;  %v2844_v20 = vld [vmem:[%s4566_s14] ss:$0 sm:$0xff]  ;;  %s2115_s14 = sshll.u32 %s1345_s17, 4  ;;  %s2116_s14 = int_to_ptr.vmem [resolvable:$true] %s2115_s14 }
 0x837   : > { %v1741_v24 = vrot.slane %v1740_v23, 1 }
 0x839   : > { %v1742_v26 = vadd.f32 %v1741_v24, %v1740_v23 }
 0x83b   : > { %v1745_v27 = vsel %vm1692_vm9, %v1742_v26, %v1735_v25 }
 0x83c   : > { %1747 = vst.msk [vmem:[#allocation6] sm:$0x3] %vm1628_vm8, %v1745_v27  ;;  %2514 = vmatmul.msk.f32.vlgmr.msrb.gmra.mxu1 %vm1434_vm2, %v1745_v27 }
 0x89f   : > { %v1974_v16 = vpop.f32.mrf.mxu2 }
 0x8a0   : > { %v1975_v17 = vadd.f32 %v2843_v15, %v1974_v16 }
 0x8b9   : > { %v1775_v39 = vpop.f32.mrf.mxu1 }
 0x8ba   : > { %v1796_v40 = vadd.f32 %v1795_v38, %v1775_v39 }
 0x8bc   : > { %v4375_v41 = vadd.f32 %v2840_v37, %v1796_v40 }
 0x8be   : > { %2516 = vmatmul.msk.f32.vlgmr.msra.gmra.mxu3 %vm1434_vm2, %v4375_v41 }
 0x8c6   : > { %2522 = vmatmul.msk.f32.vlgmr.msrb.gmra.mxu3 %vm1434_vm2, %v1745_v27 }
 0x941   : > { %v1831_v43 = vpop.f32.mrf.mxu3 }
 0x942   : > { %v1832_v44 = vadd.f32 %v2842_v42, %v1831_v43  ;;  %v2028_v42 = vld [vmem:[#allocation40 + $0x18] sm:$0xff]  ;;  %v2027_v43 = vld [vmem:[#allocation40 + $0x10] sm:$0xff] }
 0x943   : > { %2068 = vmatpush.msrb.mxu0 %v2028_v42 }
 0x944   : > { %v1866_v45 = vadd.f32 %v1864_v36, %v1832_v44 }
 0x945   : > { %2069 = vmatpush.msrb.mxu0 %v2027_v43 }
 0x946   : > { %v2518_v46 = vmul.f32 -1.442695, %v1866_v45 }
 0x948   : > { %2860 = vpow2.f32 %v2518_v46 }
 0x94e   : > { %v2861_v47 = vpop.eup %2860 }
 0x94f   : > { %v1870_v48 = vadd.f32 1.0, %v2861_v47 }
 0x951   : > { %2862 = vrcp.f32 %v1870_v48  ;;  %v1882_v52 = vand.u32 2147483648, %v1870_v48  ;;  %v1880_v54 = vand.u32 2147483647, %v1870_v48  ;;  %vm1876_vm13 = vweird.f32 %v1870_v48 }
 0x953   : > { %v1883_v56 = vor.u32 1.1754944e-38, %v1882_v52  ;;  %vm1881_vm15 = vcmp.eq.f32.partialorder %v1880_v54, 8.507059e+37 }
 0x957   : > { %v2863_v49 = vpop.eup %2862 }
 0x958   : > { %v1872_v50 = vmul.f32 %v2863_v49, %v1870_v48  ;;  %vm1877_vm12 = vweird.f32 %v2863_v49 }
 0x959   : > { %vm1878_vm14 = vmor %vm1876_vm13, %vm1877_vm12 }
 0x95a   : > { %v1873_v51 = vsub.f32 1.0, %v1872_v50 }
 0x95c   : > { %v1874_v53 = vmul.f32 %v2863_v49, %v1873_v51  ;;  %v2025_v51 = vld [vmem:[#allocation40] sm:$0xff] }
 0x95e   : > { %v1875_v55 = vadd.f32 %v2863_v49, %v1874_v53 }
 0x960   : > { %v1879_v58 = vsel %vm1878_vm14, %v2863_v49, %v1875_v55 }
 0x961   : > { %v1884_v59 = vsel %vm1881_vm15, %v1883_v56, %v1879_v58 }
 0x962   : > { %v1890_v60 = vmul.f32 %v1888_v57, %v1884_v59 }
 0x964   : > { %1892 = vrot.lane.b32.xlu2 %v1890_v60, %s3732_s6 }
 0x96c   : > { %1903 = vrot.lane.b32.xlu2 %v4363_v9, %s3734_s13  ;;  %v1897_v9 = vsub.f32 1.0, %v1884_v59 }
 0x974   : > { %1998 = vrot.lane.b32.xlu2 %v1975_v17, %s3732_s6 }
 0x97c   : > { %2014 = vrot.lane.b32.xlu2 %v1945_v7, %s3734_s13  ;;  %s4567_s13 = sld [smem:[#allocation86_spill]] }
 0x9be   : > { %v1893_v61 = vpop.permute.xlu2 %1892 }
 0x9bf   : > { %v1895_v62 = vadd.f32 %v1893_v61, %v1832_v44  ;;  %v2026_v44 = vld [vmem:[#allocation40 + $0x8] sm:$0xff] }
 0x9c0   : > { %2070 = vmatpush.msrb.mxu0 %v2026_v44 }
 0x9c1   : > { %2864 = vtanh.f32 %v1895_v62 }
 0x9c2   : > { %2071 = vmatpush.msrb.mxu0 %v2025_v51 }
 0x9c6   : > { %v1904_v8 = vpop.permute.xlu2 %1903 }
 0x9c7   : > { %v2865_v63 = vpop.eup %2864  ;;  %v1906_v11 = vmul.f32 %v1904_v8, %v1884_v59 }
 0x9c8   : > { %1899 = vrot.lane.b32.xlu1 %v2865_v63, %s3733_s3 }
 0x9ce   : > { %v1999_v37 = vpop.permute.xlu2 %1998 }
 0x9d6   : > { %v2015_v45 = vpop.permute.xlu2 %2014 }
 0xa3a   : > { %v1900_v10 = vpop.permute.xlu1 %1899 }
 0xa3b   : > { %v1902_v12 = vmul.f32 %v1900_v10, %v1897_v9 }
 0xa3d   : > { %v1907_v13 = vadd.f32 %v1906_v11, %v1902_v12 }
 0xa3f   : > { %1909 = vrot.lane.b32.xlu1 %v1907_v13, %s3733_s3 }
 0xab1   : > { %v1910_v18 = vpop.permute.xlu1 %1909 }
 0xab2   : > { %1912 = vst.msk [vmem:[#allocation4] sm:$0x3] %vm1628_vm8, %v1910_v18  ;;  %v1913_v19 = vadd.f32 %v1910_v18, %v4375_v41 }
 0xab4   : > { %2519 = vmatmul.msk.f32.vlgmr.msra.gmra.mxu1 %vm1434_vm2, %v1913_v19 }
 0xb31   : > { %v1942_v21 = vpop.f32.mrf.mxu1 }
 0xb32   : > { %v1943_v22 = vadd.f32 %v2844_v20, %v1942_v21 }
 0xb34   : > { %v1977_v23 = vadd.f32 %v1975_v17, %v1943_v22 }
 0xb36   : > { %v2521_v24 = vmul.f32 -1.442695, %v1977_v23 }
 0xb38   : > { %2866 = vpow2.f32 %v2521_v24 }
 0xb3e   : > { %v2867_v25 = vpop.eup %2866 }
 0xb3f   : > { %v1981_v26 = vadd.f32 1.0, %v2867_v25 }
 0xb41   : > { %2868 = vrcp.f32 %v1981_v26  ;;  %v1993_v30 = vand.u32 2147483648, %v1981_v26  ;;  %v1991_v32 = vand.u32 2147483647, %v1981_v26  ;;  %vm1987_vm1 = vweird.f32 %v1981_v26 }
 0xb43   : > { %v1994_v34 = vor.u32 1.1754944e-38, %v1993_v30  ;;  %vm1992_vm4 = vcmp.eq.f32.partialorder %v1991_v32, 8.507059e+37 }
 0xb47   : > { %v2869_v27 = vpop.eup %2868 }
 0xb48   : > { %v1983_v28 = vmul.f32 %v2869_v27, %v1981_v26  ;;  %vm1988_vm0 = vweird.f32 %v2869_v27 }
 0xb49   : > { %vm1989_vm3 = vmor %vm1987_vm1, %vm1988_vm0 }
 0xb4a   : > { %v1984_v29 = vsub.f32 1.0, %v1983_v28 }
 0xb4c   : > { %v1985_v31 = vmul.f32 %v2869_v27, %v1984_v29 }
 0xb4e   : > { %v1986_v33 = vadd.f32 %v2869_v27, %v1985_v31 }
 0xb50   : > { %v1990_v35 = vsel %vm1989_vm3, %v2869_v27, %v1986_v33 }
 0xb51   : > { %v1995_v36 = vsel %vm1992_vm4, %v1994_v34, %v1990_v35 }
 0xb52   : > { %v2001_v38 = vmul.f32 %v1999_v37, %v1995_v36  ;;  %v2008_v46 = vsub.f32 1.0, %v1995_v36  ;;  %v2017_v48 = vmul.f32 %v2015_v45, %v1995_v36 }
 0xb54   : > { %2003 = vrot.lane.b32.xlu0 %v2001_v38, %s3732_s6  ;;  %s2526_s6 = sshll.u32 %s4567_s13, 1 }
 0xb55   : > { %s2113_s8 = scalar_lea.hbm %s4568_s4, %s2526_s6 }
 0xb56   : > { %s2117_s7 = sshll.u32 %s2113_s8, 4  ;;  %s2118_s7 = int_to_ptr.hbm [resolvable:$true] %s2117_s7 }
 0xbc6   : > { %v2004_v39 = vpop.permute.xlu0 %2003 }
 0xbc7   : > { %v2006_v40 = vadd.f32 %v2004_v39, %v1943_v22 }
 0xbc9   : > { %2870 = vtanh.f32 %v2006_v40 }
 0xbcf   : > { %v2871_v41 = vpop.eup %2870 }
 0xbd0   : > { %2010 = vrot.lane.b32.xlu1 %v2871_v41, %s3733_s3 }
 0xc42   : > { %v2011_v47 = vpop.permute.xlu1 %2010 }
 0xc43   : > { %v2013_v49 = vmul.f32 %v2011_v47, %v2008_v46 }
 0xc45   : > { %v2018_v50 = vadd.f32 %v2017_v48, %v2013_v49 }
 0xc47   : > { %2020 = vrot.lane.b32.xlu0 %v2018_v50, %s3733_s3  ;;  %s3546_s3 = sshra.s32 %s2118_s7, 4  ;;  %s3547_s3 = int_to_ptr.hbm [resolvable:$true] %s3546_s3 }
 0xc48   : > { %s3548_s12 = scalar_lea.hbm %s3547_s3, 2  ;;  %p3553_p1 = scmp.lt.s32.totalorder %s3547_s3, %s4568_s4 }
 0xc49   : > { %p3549_p13 = scmp.ne.s32.totalorder %s3547_s3, %s3548_s12  ;;  %p3554_p3 = scmp.lt.s32.totalorder %s3552_s15, %s3548_s12 }
 0xc4b   : > { %p3550_p0 = pnand %p3549_p13, %p4245_p6  ;;  %p3555_p4 = por %p3554_p3, %p3553_p1 }
 0xc4d   : > { %p3551_p5 = pneg %p3550_p0 }
 0xc4f   : > { %p3556_p7 = pnand %p3555_p4, %p3551_p5 }
 0xcb9   : > { %v2021_v52 = vpop.permute.xlu0 %2020 }
 0xcba   : > { %2023 = vst.msk [vmem:[#allocation5] sm:$0x3] %vm1628_vm8, %v2021_v52  ;;  %v2024_v53 = vadd.f32 %v2021_v52, %v1913_v19 }
 0xcbc   : > { %2523 = vmatmul.msk.f32.vlgmr.msrb.gmra.mxu0 %vm1434_vm2, %v2024_v53 }
 0xcbd   : > { %3559 = shalt.err (!%p3556_p7)
}
 0xcbe   : > { %s4569_s17 = sld [smem:[#allocation84_spill]]  ;;  %v2050_v55 = vpop.f32.mrf.mxu3  ;;  %s4571_s12 = scalar_lea.vmem [#allocation43], %s4273_s5 }
 0xcbf   : > { %s4570_s13 = sld [smem:[#allocation83_spill]]  ;;  %s2101_s15 = sshll.u32 %s4571_s12, 4  ;;  %s2102_s15 = int_to_ptr.vmem [resolvable:$true] %s2101_s15 }
 0xcc0   : > { %2617 = dma.vmem_to_hbm [thread:$0]  (%p4245_p6), %s2116_s14, 32, %s2118_s7, %s2089_s11  }
 0xcc1   : > { %s4572_s4 = smov %s4571_s12  ;;  %s2084_s16 = scalar_lea.sflag [#allocation10], %s4270_s26 }
 0xcc4   : > { %s2099_s8 = scalar_lea.hbm %s4569_s17, %s2526_s6  ;;  %s3580_s11 = scalar_lea.hbm %s4569_s17, 8 }
 0xcc5   : > { %v2845_v54 = vld [vmem:[%s4570_s13] ss:$0 sm:$0xff]  ;;  %s2103_s3 = sshll.u32 %s2099_s8, 4  ;;  %s2104_s3 = int_to_ptr.hbm [resolvable:$true] %s2103_s3 }
 0xcc6   : > { %s3574_s18 = sshra.s32 %s2104_s3, 4  ;;  %s3575_s18 = int_to_ptr.hbm [resolvable:$true] %s3574_s18 }
 0xcc7   : > { %s3576_s7 = scalar_lea.hbm %s3575_s18, 2  ;;  %p3581_p11 = scmp.lt.s32.totalorder %s3575_s18, %s4569_s17 }
 0xcc8   : > { %p3577_p9 = scmp.ne.s32.totalorder %s3575_s18, %s3576_s7  ;;  %p3582_p8 = scmp.lt.s32.totalorder %s3580_s11, %s3576_s7 }
 0xcca   : > { %p3578_p10 = pnand %p3577_p9, %p4245_p6  ;;  %p3583_p12 = por %p3582_p8, %p3581_p11 }
 0xccc   : > { %p3579_p2 = pneg %p3578_p10 }
 0xcce   : > { %p3584_p13 = pnand %p3583_p12, %p3579_p2 }
 0xd39   : > { %v2073_v56 = vpop.f32.mrf.mxu0 }
 0xd3a   : > { %v2074_v57 = vadd.f32 %v2073_v56, %v2050_v55 }
 0xd3c   : > { %v2080_v58 = vadd.f32 %v2845_v54, %v2074_v57 }
 0xd3e   : > { %2081 = vst.msk [vmem:[%s4572_s4] sm:$0x3] %vm1628_vm8, %v2080_v58 }
 0xd3f   : > { %3587 = shalt.err (!%p3584_p13)
}
 0xd40   : > { %2616 = dma.vmem_to_hbm [thread:$0]  (%p4245_p6), %s2102_s15, 32, %s2104_s3, %s2084_s16  }
 0xd41 PF: > { %p2738_p0 = scmp.ge.s32.totalorder %s3674_s2, 2  ;;  %s2129_s26 = sand.u32 1, %s3662_s28  }
 0xd42   : > { %p4573_p5 = scmp.ne.s32.totalorder %s4532_s9, 0  ;;  %s2130_s5 = scalar_lea.sflag [#allocation10], %s2129_s26 }
 0xd44   : > { %p2689_p1 = pnand %p2738_p0, %p4573_p5 }
 0xd46   : > { %p2690_p3 = pneg %p2689_p1 }
 0xd48   : > { %3653 = dma.done.wait (%p2690_p3), %s2130_s5, 32  }
 0xd49   : > { %3655 = vsyncadd (%p2690_p3), %s2130_s5, 4294967264  ;;  %s2140_s18 = scalar_lea.sflag [#allocation45], %s2129_s26 }
 0xd4a   : > { %3657 = dma.done.wait (%p2690_p3), %s2140_s18, 32  }
 0xd4b   : > { %3659 = vsyncadd (%p2690_p3), %s2140_s18, 4294967264  ;;  %p93_p6 = scmp.ge.s32.totalorder %s4225_s22, 6   ;;  %s4574_s28 = smov %s3666_s0 }
 0xd4c   : > { %s4575_s0 = smov %s3670_s1  ;;  %s4576_s1 = smov %s4237_s10 }
 0xd4d   : > { %s4577_s2 = smov %s4225_s22  ;;  %95 = sbr.rel (!%p93_p6) target bundleno = 81 (0x51), region = 328 }
 0xd52   :  { %2146 = vsyncpa [#allocation9], 1 }
 0xd53   :  { %2148 = vsyncpa [#allocation9 + $0x1], 1 }
 0xd54   :  { %2149 = vsyncpa [#allocation12], 1 }
 0xd55   :  { %2150 = vsyncpa [#allocation15], 1 }
 0xd56   :  { %2151 = vsyncpa [#allocation18], 1 }
 0xd57   :  { %2152 = vsyncpa [#allocation21], 1 }
 0xd58   :  { %2153 = vsyncpa [#allocation24], 1 }
 0xd59   :  { %2154 = vsyncpa [#allocation27], 1 }
 0xd5a   :  { %2155 = vsyncpa [#allocation30], 1 }
 0xd5b   :  { %2156 = vsyncpa [#allocation33], 1 }
 0xd5c   :  { %2157 = vsyncpa [#allocation36], 1 }
 0xd5d   :  { %2158 = vsyncpa [#allocation39], 1 }
 0xd5e   :  { %2159 = vsyncpa [#allocation42], 1 }
 0xd5f   :  { %2160 = vsyncpa [#allocation10], 1 }
 0xd60   :  { %2162 = vsyncpa [#allocation10 + $0x1], 1 }
 0xd61   :  { %2163 = vsyncpa [#allocation45], 1 }
 0xd62   :  { %2165 = vsyncpa [#allocation45 + $0x1], 1 }

</bundles_post_ra>
